<compile_context>
chip_gen: v7x
topology: tpu7x:2x2x1
jax: 0.10.0
libtpu: 0.0.40
codegen_flags: <defaults>
</compile_context>

<pallas_src>
import functools

import jax
import jax.numpy as jnp
from jax.experimental import pallas as pl
from jax.experimental.pallas import tpu as pltpu

SELU_ALPHA = 1.6732632423543772
SELU_SCALE = 1.0507009873554805
LANE = 128
BATCH_ALIGN = 16   # covers bf16 sublane packing for the streamed (TB, S) tile


def _round_up(x, m):
    return ((x + m - 1) // m) * m


def _selu(x):
    # Clamp the exp argument so the unselected (positive) lane never sees inf.
    # Dtype-generic: stays in x.dtype (bf16 on v6e/v7x, f32 elsewhere).
    neg = SELU_ALPHA * (jnp.exp(jnp.minimum(x, 0.0)) - 1.0)
    return SELU_SCALE * jnp.where(x > 0, x, neg)


def actor_kernel(x_ref, w1_ref, b1_ref, w2_ref, b2_ref, w3_ref, b3_ref,
                 out_ref, *, ew_dtype):
    """One batch tile: Linear->SELU -> Linear->SELU -> Linear->tanh.

    BN (eval) is pre-folded into w2/b2 and w3/b3 on the host.  Matmul inputs
    are bf16 (f32 accumulation); the SELU path runs in `ew_dtype`.
    """
    h = jnp.dot(x_ref[...], w1_ref[...],
                preferred_element_type=jnp.float32) + b1_ref[...]       # [TB, F] f32
    h = _selu(h.astype(ew_dtype))

    h = jnp.dot(h.astype(jnp.bfloat16), w2_ref[...],
                preferred_element_type=jnp.float32) + b2_ref[...]       # [TB, F] f32
    h = _selu(h.astype(ew_dtype))

    h = jnp.dot(h.astype(jnp.bfloat16), w3_ref[...],
                preferred_element_type=jnp.float32) + b3_ref[...]       # [TB, 128] f32
    out_ref[...] = jnp.tanh(h).astype(out_ref.dtype)                    # lane-dense store


def _device_kind():
    try:
        return jax.devices()[0].device_kind.lower()
    except Exception:
        return ""


def _tensorcores_per_chip():
    kind = _device_kind()
    # Megacore chips have 2 TensorCores per chip; keep >= 2 grid steps so
    # dimension_semantics=("parallel",) actually feeds both.
    return 2 if any(v in kind for v in ("v7", "v4", "v3")) else 1


def _elementwise_dtype():
    kind = _device_kind()
    # v6e/v7x VPU & EUP are bf16-capable (2 elems/lane); v5e and older are not.
    return jnp.bfloat16 if ("v6" in kind or "v7" in kind) else jnp.float32


def _choose_tiling(batch, tb_max, n_cores):
    """Return (tb, grid, b_pad).

    Large tiles to amortize the ~0.35us per-grid-step overhead; on megacore
    parts keep the grid a multiple of the TensorCore count; size the tile from
    the rounded-up grid so only a small number of rows is padded.
    """
    b_al = _round_up(batch, BATCH_ALIGN)
    grid = pl.cdiv(b_al, min(max(tb_max, BATCH_ALIGN), b_al))
    if n_cores > 1 and b_al >= BATCH_ALIGN * n_cores:
        grid = _round_up(grid, n_cores)
    tb = _round_up(pl.cdiv(b_al, grid), BATCH_ALIGN)
    grid = pl.cdiv(b_al, tb)
    if n_cores > 1 and b_al >= BATCH_ALIGN * n_cores:
        grid = _round_up(max(grid, n_cores), n_cores)
    return tb, grid, grid * tb


def actor_forward(state, kparams, action_size, *, tb=1024, out_dtype=jnp.float32):
    """state: [B, state_size] f32 -> actions: [B, action_size]."""
    w1, b1, w2, b2, w3, b3 = kparams
    B, S = state.shape
    a_pad = w3.shape[1]

    n_cores = _tensorcores_per_chip()
    ew_dtype = _elementwise_dtype()
    tb, grid, b_pad = _choose_tiling(B, tb, n_cores)

    # Stream the batch in bf16 (halves the only tiled-input DMA; the MXU
    # consumes bf16 anyway, so no accuracy change vs casting in-kernel).
    x = state.astype(jnp.bfloat16)
    if b_pad != B:
        # TODO(synk): for rollout-sized batches, handle the remainder with a
        # second tiny pallas_call instead of materializing a padded copy.
        x = jnp.pad(x, ((0, b_pad - B), (0, 0)))

    const = lambda arr: pl.BlockSpec(arr.shape, lambda i: (0, 0))  # VMEM-resident

    out = pl.pallas_call(
        functools.partial(actor_kernel, ew_dtype=ew_dtype),
        out_shape=jax.ShapeDtypeStruct((b_pad, a_pad), out_dtype),
        grid=(grid,),
        in_specs=[
            pl.BlockSpec((tb, S), lambda i: (i, 0)),   # streamed batch tile (bf16)
            const(w1), const(b1),
            const(w2), const(b2),
            const(w3), const(b3),
        ],
        out_specs=pl.BlockSpec((tb, a_pad), lambda i: (i, 0)),
        compiler_params=pltpu.CompilerParams(dimension_semantics=("parallel",)),
    )(x, w1, b1, w2, b2, w3, b3)

    return out[:B, :action_size]


def init_params(key, state_size, action_size, fc_units=128):
    """Raw parameters mirroring PyTorch defaults.

    Linear: weight/bias ~ U(-1/sqrt(in), 1/sqrt(in)); last-layer weight
    overridden to U(-0.003, 0.003). Weights are [in, out]. BatchNorm uses
    default init (gamma=1, beta=0, running_mean=0, running_var=1), expressed as
    an eval-mode per-feature scale/shift.
    """
    keys = jax.random.split(key, 6)
    eps = 1e-5

    def lin(kw, kb, fan_in, fan_out, w_bound=None):
        bound = 1.0 / jnp.sqrt(fan_in)
        wb = bound if w_bound is None else w_bound
        w = jax.random.uniform(kw, (fan_in, fan_out), jnp.float32, -wb, wb)
        b = jax.random.uniform(kb, (1, fan_out), jnp.float32, -bound, bound)
        return w, b

    w1, b1 = lin(keys[0], keys[1], state_size, fc_units)
    w2, b2 = lin(keys[2], keys[3], fc_units, fc_units)
    w3, b3 = lin(keys[4], keys[5], fc_units, action_size, w_bound=0.003)

    scale = jnp.full((1, fc_units), 1.0 / jnp.sqrt(1.0 + eps), jnp.float32)
    shift = jnp.zeros((1, fc_units), jnp.float32)

    return (w1, b1, scale, shift, w2, b2, scale, shift, w3, b3)


def prepare_params(raw_params):
    """Host-side glue: fold eval-mode BN into the following Linear, pad the
    output head to a lane-dense 128 columns, cast weights to bf16."""
    (w1, b1, s1, t1, w2, b2, s2, t2, w3, b3) = raw_params
    F = w2.shape[0]
    A = w3.shape[1]

    # BN fold (exact in eval mode):  (h*s + t) @ W + b  ==  h @ (s.T*W) + (t@W + b)
    w2f = s1.T * w2
    b2f = b2 + t1 @ w2
    w3f = s2.T * w3
    b3f = b3 + t2 @ w3

    # Lane-dense output head: pad A -> multiple of 128 with zero columns.
    a_pad = _round_up(max(A, LANE), LANE)
    w3p = jnp.zeros((F, a_pad), jnp.float32).at[:, :A].set(w3f)
    b3p = jnp.zeros((1, a_pad), jnp.float32).at[:, :A].set(b3f)

    return (w1.astype(jnp.bfloat16), b1,
            w2f.astype(jnp.bfloat16), b2f,
            w3p.astype(jnp.bfloat16), b3p)


def actor_reference(state, raw_params):
    """Pure f32 reference matching the PyTorch forward (eval mode)."""
    (w1, b1, s1, t1, w2, b2, s2, t2, w3, b3) = raw_params
    h = _selu(state @ w1 + b1) * s1 + t1
    h = _selu(h @ w2 + b2) * s2 + t2
    return jnp.tanh(h @ w3 + b3)


if __name__ == "__main__":
    B, STATE, ACTION, FC = 500, 32, 8, 128   # B not a tile multiple -> exercises padding

    key = jax.random.PRNGKey(0)
    k_state, k_params = jax.random.split(key)
    state = jax.random.normal(k_state, (B, STATE), jnp.float32)

    raw_params = init_params(k_params, STATE, ACTION, FC)
    kparams = prepare_params(raw_params)

    out = actor_forward(state, kparams, ACTION)
    out = jax.block_until_ready(out)

    ref = actor_reference(state, raw_params)
    assert out.shape == (B, ACTION)
    # bf16 matmul inputs / bf16 SELU path (f32 accumulation) vs pure f32
    # reference: the tanh-bounded, tiny last-layer-weight head keeps the error
    # well below 1e-3 at these fan-ins.
    max_err = float(jnp.max(jnp.abs(out - ref)))
    assert jnp.allclose(out, ref, atol=3e-3, rtol=2e-2), f"max_err={max_err}"

    print("KERNEL_OK")
</pallas_src>

<mosaic_0001>
module attributes {stable_mosaic.version = 11 : i64} {
  func.func @actor_kernel(%arg0: i32, %arg1: memref<512x32xbf16, #tpu.memory_space<vmem>>, %arg2: memref<32x128xbf16, #tpu.memory_space<vmem>>, %arg3: memref<1x128xf32, #tpu.memory_space<vmem>>, %arg4: memref<128x128xbf16, #tpu.memory_space<vmem>>, %arg5: memref<1x128xf32, #tpu.memory_space<vmem>>, %arg6: memref<128x128xbf16, #tpu.memory_space<vmem>>, %arg7: memref<1x128xf32, #tpu.memory_space<vmem>>, %arg8: memref<512x128xf32, #tpu.memory_space<vmem>>) attributes {dimension_semantics = [#tpu.dimension_semantics<parallel>], iteration_bounds = array<i64: 1>, scalar_prefetch = 0 : i64, scratch_operands = 0 : i64, tpu.core_type = #tpu.core_type<tc>, window_params = [{transform_indices = @transform_0, window_bounds = array<i64: 512, 32>}, {pipeline_mode = #tpu.pipeline_mode<synchronous>, transform_indices = @transform_1, window_bounds = array<i64: 32, 128>}, {pipeline_mode = #tpu.pipeline_mode<synchronous>, transform_indices = @transform_2, window_bounds = array<i64: 1, 128>}, {pipeline_mode = #tpu.pipeline_mode<synchronous>, transform_indices = @transform_3, window_bounds = array<i64: 128, 128>}, {pipeline_mode = #tpu.pipeline_mode<synchronous>, transform_indices = @transform_4, window_bounds = array<i64: 1, 128>}, {pipeline_mode = #tpu.pipeline_mode<synchronous>, transform_indices = @transform_5, window_bounds = array<i64: 128, 128>}, {pipeline_mode = #tpu.pipeline_mode<synchronous>, transform_indices = @transform_6, window_bounds = array<i64: 1, 128>}, {transform_indices = @transform_7, window_bounds = array<i64: 512, 128>}]} {
    %c0 = arith.constant 0 : index
    %c0_0 = arith.constant 0 : index
    %0 = vector.load %arg1[%c0, %c0_0] : memref<512x32xbf16, #tpu.memory_space<vmem>>, vector<512x32xbf16>
    %c0_1 = arith.constant 0 : index
    %c0_2 = arith.constant 0 : index
    %1 = vector.load %arg2[%c0_1, %c0_2] : memref<32x128xbf16, #tpu.memory_space<vmem>>, vector<32x128xbf16>
    %cst = arith.constant dense<0.000000e+00> : vector<512x128xf32>
    %2 = tpu.matmul %0, %1, %cst {dimension_numbers = #tpu.dot_dimension_numbers<[1], [0], [0], [1], [0, 0, 1, 1], [], []>} : vector<512x32xbf16>, vector<32x128xbf16>, vector<512x128xf32> -> vector<512x128xf32>
    %c0_3 = arith.constant 0 : index
    %c0_4 = arith.constant 0 : index
    %3 = vector.load %arg3[%c0_3, %c0_4] : memref<1x128xf32, #tpu.memory_space<vmem>>, vector<1x128xf32>
    %4 = vector.broadcast %3 : vector<1x128xf32> to vector<512x128xf32>
    %5 = arith.addf %2, %4 : vector<512x128xf32>
    %cst_5 = arith.constant 0.000000e+00 : f32
    %6 = vector.broadcast %cst_5 : f32 to vector<512x128xf32>
    %7 = arith.minimumf %5, %6 : vector<512x128xf32>
    %8 = math.exp %7 : vector<512x128xf32>
    %cst_6 = arith.constant 1.000000e+00 : f32
    %9 = vector.broadcast %cst_6 : f32 to vector<512x128xf32>
    %10 = arith.subf %8, %9 : vector<512x128xf32>
    %cst_7 = arith.constant 1.67326319 : f32
    %11 = vector.broadcast %cst_7 : f32 to vector<512x128xf32>
    %12 = arith.mulf %11, %10 : vector<512x128xf32>
    %cst_8 = arith.constant 0.000000e+00 : f32
    %13 = vector.broadcast %cst_8 : f32 to vector<512x128xf32>
    %14 = arith.cmpf ogt, %5, %13 : vector<512x128xf32>
    %15 = arith.select %14, %5, %12 : vector<512x128xi1>, vector<512x128xf32>
    %cst_9 = arith.constant 1.05070102 : f32
    %16 = vector.broadcast %cst_9 : f32 to vector<512x128xf32>
    %17 = arith.mulf %16, %15 : vector<512x128xf32>
    %18 = arith.truncf %17 : vector<512x128xf32> to vector<512x128xbf16>
    %c0_10 = arith.constant 0 : index
    %c0_11 = arith.constant 0 : index
    %19 = vector.load %arg4[%c0_10, %c0_11] : memref<128x128xbf16, #tpu.memory_space<vmem>>, vector<128x128xbf16>
    %cst_12 = arith.constant dense<0.000000e+00> : vector<512x128xf32>
    %20 = tpu.matmul %18, %19, %cst_12 {dimension_numbers = #tpu.dot_dimension_numbers<[1], [0], [0], [1], [0, 0, 1, 1], [], []>} : vector<512x128xbf16>, vector<128x128xbf16>, vector<512x128xf32> -> vector<512x128xf32>
    %c0_13 = arith.constant 0 : index
    %c0_14 = arith.constant 0 : index
    %21 = vector.load %arg5[%c0_13, %c0_14] : memref<1x128xf32, #tpu.memory_space<vmem>>, vector<1x128xf32>
    %22 = vector.broadcast %21 : vector<1x128xf32> to vector<512x128xf32>
    %23 = arith.addf %20, %22 : vector<512x128xf32>
    %cst_15 = arith.constant 0.000000e+00 : f32
    %24 = vector.broadcast %cst_15 : f32 to vector<512x128xf32>
    %25 = arith.minimumf %23, %24 : vector<512x128xf32>
    %26 = math.exp %25 : vector<512x128xf32>
    %cst_16 = arith.constant 1.000000e+00 : f32
    %27 = vector.broadcast %cst_16 : f32 to vector<512x128xf32>
    %28 = arith.subf %26, %27 : vector<512x128xf32>
    %cst_17 = arith.constant 1.67326319 : f32
    %29 = vector.broadcast %cst_17 : f32 to vector<512x128xf32>
    %30 = arith.mulf %29, %28 : vector<512x128xf32>
    %cst_18 = arith.constant 0.000000e+00 : f32
    %31 = vector.broadcast %cst_18 : f32 to vector<512x128xf32>
    %32 = arith.cmpf ogt, %23, %31 : vector<512x128xf32>
    %33 = arith.select %32, %23, %30 : vector<512x128xi1>, vector<512x128xf32>
    %cst_19 = arith.constant 1.05070102 : f32
    %34 = vector.broadcast %cst_19 : f32 to vector<512x128xf32>
    %35 = arith.mulf %34, %33 : vector<512x128xf32>
    %36 = arith.truncf %35 : vector<512x128xf32> to vector<512x128xbf16>
    %c0_20 = arith.constant 0 : index
    %c0_21 = arith.constant 0 : index
    %37 = vector.load %arg6[%c0_20, %c0_21] : memref<128x128xbf16, #tpu.memory_space<vmem>>, vector<128x128xbf16>
    %cst_22 = arith.constant dense<0.000000e+00> : vector<512x128xf32>
    %38 = tpu.matmul %36, %37, %cst_22 {dimension_numbers = #tpu.dot_dimension_numbers<[1], [0], [0], [1], [0, 0, 1, 1], [], []>} : vector<512x128xbf16>, vector<128x128xbf16>, vector<512x128xf32> -> vector<512x128xf32>
    %c0_23 = arith.constant 0 : index
    %c0_24 = arith.constant 0 : index
    %39 = vector.load %arg7[%c0_23, %c0_24] : memref<1x128xf32, #tpu.memory_space<vmem>>, vector<1x128xf32>
    %40 = vector.broadcast %39 : vector<1x128xf32> to vector<512x128xf32>
    %41 = arith.addf %38, %40 : vector<512x128xf32>
    %42 = math.tanh %41 : vector<512x128xf32>
    %c0_25 = arith.constant 0 : index
    %c0_26 = arith.constant 0 : index
    %43 = vector.load %arg8[%c0_25, %c0_26] : memref<512x128xf32, #tpu.memory_space<vmem>>, vector<512x128xf32>
    tpu.vector_store %arg8[%c0_25, %c0_26], %42 {strides = array<i32>} : memref<512x128xf32, #tpu.memory_space<vmem>>, vector<512x128xf32>,
    return
  }
  func.func @transform_0(%arg0: i32) -> (i32, i32) {
    %c0_i32 = arith.constant 0 : i32
    %c0_i32_0 = arith.constant 0 : i32
    return %arg0, %c0_i32 : i32, i32
  }
  func.func @transform_1(%arg0: i32) -> (i32, i32) {
    %c0_i32 = arith.constant 0 : i32
    %c0_i32_0 = arith.constant 0 : i32
    %c0_i32_1 = arith.constant 0 : i32
    return %c0_i32, %c0_i32_0 : i32, i32
  }
  func.func @transform_2(%arg0: i32) -> (i32, i32) {
    %c0_i32 = arith.constant 0 : i32
    %c0_i32_0 = arith.constant 0 : i32
    %c0_i32_1 = arith.constant 0 : i32
    return %c0_i32, %c0_i32_0 : i32, i32
  }
  func.func @transform_3(%arg0: i32) -> (i32, i32) {
    %c0_i32 = arith.constant 0 : i32
    %c0_i32_0 = arith.constant 0 : i32
    %c0_i32_1 = arith.constant 0 : i32
    return %c0_i32, %c0_i32_0 : i32, i32
  }
  func.func @transform_4(%arg0: i32) -> (i32, i32) {
    %c0_i32 = arith.constant 0 : i32
    %c0_i32_0 = arith.constant 0 : i32
    %c0_i32_1 = arith.constant 0 : i32
    return %c0_i32, %c0_i32_0 : i32, i32
  }
  func.func @transform_5(%arg0: i32) -> (i32, i32) {
    %c0_i32 = arith.constant 0 : i32
    %c0_i32_0 = arith.constant 0 : i32
    %c0_i32_1 = arith.constant 0 : i32
    return %c0_i32, %c0_i32_0 : i32, i32
  }
  func.func @transform_6(%arg0: i32) -> (i32, i32) {
    %c0_i32 = arith.constant 0 : i32
    %c0_i32_0 = arith.constant 0 : i32
    %c0_i32_1 = arith.constant 0 : i32
    return %c0_i32, %c0_i32_0 : i32, i32
  }
  func.func @transform_7(%arg0: i32) -> (i32, i32) {
    %c0_i32 = arith.constant 0 : i32
    %c0_i32_0 = arith.constant 0 : i32
    return %arg0, %c0_i32 : i32, i32
  }
}

</mosaic_0001>

<bundles_post_ra>
// kernel: tpu_custom_call.1
= control target key start
LH: loop header
LB: loop body
LE: loop exit
PB: predicated region body
PF: predicated region fallthrough
CT: control target
= control target key end

     0   :  { %vm275_vm0 = vcmask 261120   ;;  %s5154_s0 = inlined_call_operand.vmem [shape: bf16[512,32], index: 0, kind: input, shape index: {}]   ;;  %s5155_s1 = inlined_call_operand.vmem [shape: bf16[32,128], index: 1, kind: input, shape index: {}]   ;;  %s5156_s2 = inlined_call_operand.vmem [shape: f32[1,128], index: 2, kind: input, shape index: {}]   ;;  %s5157_s3 = inlined_call_operand.vmem [shape: bf16[128,128], index: 3, kind: input, shape index: {}]   ;;  %s5158_s4 = inlined_call_operand.vmem [shape: f32[1,128], index: 4, kind: input, shape index: {}]   ;;  %s5159_s5 = inlined_call_operand.vmem [shape: bf16[128,128], index: 5, kind: input, shape index: {}]   ;;  %s5160_s6 = inlined_call_operand.vmem [shape: f32[1,128], index: 6, kind: input, shape index: {}]   ;;  %s5161_s7 = inlined_call_operand.hbm [shape: f32[512,128], index: 7, kind: output, shape index: {}]  }
   0x1   :  { %v3175_v0 = vld [vmem:[%s5155_s1] sm:$0xff]   ;;  %v3176_v1 = vld [vmem:[%s5155_s1 + $0x8] sm:$0xff]   ;;  %v3179_v4 = vld [vmem:[%s5154_s0 + $0x10] sm:$0xff]  }
   0x2   :  { %2940 = vmatprep.subr.bf16.mxu0 %v3175_v0  ;;  %v3177_v2 = vld [vmem:[%s5154_s0] sm:$0xff]   ;;  %3168 = vmatprep.subr.bf16.mxu1 %v3175_v0  ;;  %v3178_v3 = vld [vmem:[%s5154_s0 + $0x8] sm:$0xff]   ;;  %v3180_v5 = vld [vmem:[%s5154_s0 + $0x18] sm:$0xff]  }
   0x3   :  { %2941 = vmatpush3.bf16.msra.mxu0 %v3175_v0  ;;  %3170 = vmatpush3.bf16.msra.mxu1 %v3175_v0  ;;  %v3181_v6 = vld [vmem:[%s5154_s0 + $0x20] sm:$0xff]   ;;  %v3190_v8 = vld [vmem:[%s5154_s0 + $0x88] sm:$0xff]   ;;  %v3193_v9 = vld [vmem:[%s5154_s0 + $0x90] sm:$0xff]  }
   0x4   :  { %2942 = vmatprep.subr.bf16.mxu0 %v3176_v1  ;;  %2944 = vmatprep.mubr.msk.bf16.mxu0 %vm275_vm0, %v3177_v2  ;;  %v3189_v7 = vld [vmem:[%s5154_s0 + $0x80] sm:$0xff]   ;;  %v3182_v10 = vld [vmem:[%s5154_s0 + $0x28] sm:$0xff]   ;;  %v3194_v11 = vld [vmem:[%s5154_s0 + $0x98] sm:$0xff]  }
   0x5   :  { %3169 = vmatprep.subr.bf16.mxu1 %v3176_v1  ;;  %2976 = vmatprep.mubr.msk.bf16.mxu1 %vm275_vm0, %v3189_v7  ;;  %v3197_v12 = vld [vmem:[%s5154_s0 + $0xa0] sm:$0xff]   ;;  %v3183_v13 = vld [vmem:[%s5154_s0 + $0x30] sm:$0xff]   ;;  %v3184_v14 = vld [vmem:[%s5154_s0 + $0x38] sm:$0xff]  }
   0x6   :  { %v3198_v15 = vld [vmem:[%s5154_s0 + $0xa8] sm:$0xff]   ;;  %v3199_v16 = vld [vmem:[%s5154_s0 + $0xb0] sm:$0xff]   ;;  %v3185_v17 = vld [vmem:[%s5154_s0 + $0x40] sm:$0xff]  }
   0x7   :  { %2943 = vmatpush3.bf16.msra.mxu0 %v3176_v1  ;;  %3171 = vmatpush3.bf16.msra.mxu1 %v3176_v1  ;;  %v3209_v18 = vld [vmem:[%s5157_s3] sm:$0xff]   ;;  %v3210_v19 = vld [vmem:[%s5157_s3 + $0x8] sm:$0xff]   ;;  %v3200_v21 = vld [vmem:[%s5154_s0 + $0xb8] sm:$0xff]  }
   0x8   :  { %v3186_v20 = vld [vmem:[%s5154_s0 + $0x48] sm:$0xff]   ;;  %3008 = vmatprep.subr.bf16.mxu1 %v3209_v18  ;;  %v3187_v22 = vld [vmem:[%s5154_s0 + $0x50] sm:$0xff]   ;;  %v3201_v23 = vld [vmem:[%s5154_s0 + $0xc0] sm:$0xff]  }
   0x9   :  { %v3211_v24 = vld [vmem:[%s5157_s3 + $0x10] sm:$0xff]   ;;  %v3212_v25 = vld [vmem:[%s5157_s3 + $0x18] sm:$0xff]   ;;  %v3202_v26 = vld [vmem:[%s5154_s0 + $0xc8] sm:$0xff]  }
   0xa   :  { %2945 = vmatmul.mubr.msk.bf16.vlgmr.msra.gmra.mrb[0].mxu0 %vm275_vm0, %v3178_v3  ;;  %2977 = vmatmul.mubr.msk.bf16.vlgmr.msra.gmra.mrb[0].mxu1 %vm275_vm0, %v3190_v8  ;;  %v3188_v27 = vld [vmem:[%s5154_s0 + $0x58] sm:$0xff]   ;;  %v3203_v28 = vld [vmem:[%s5154_s0 + $0xd0] sm:$0xff]  }
   0xb   :  { %2948 = vmatprep.mubr.msk.bf16.mxu0 %vm275_vm0, %v3179_v4  ;;  %2980 = vmatprep.mubr.msk.bf16.mxu1 %vm275_vm0, %v3193_v9 }
   0xc   :  { %3009 = vmatpush3.bf16.msra.mxu1 %v3209_v18 }
   0xd   :  { %3010 = vmatprep.subr.bf16.mxu1 %v3210_v19 }
  0x10   :  { %3011 = vmatpush3.bf16.msra.mxu1 %v3210_v19 }
  0x11   :  { %3012 = vmatprep.subr.bf16.mxu1 %v3211_v24 }
  0x12   :  { %2949 = vmatmul.mubr.msk.bf16.gmra.mrb[4].mxu0 %vm275_vm0, %v3180_v5  ;;  %2981 = vmatmul.mubr.msk.bf16.gmra.mrb[4].mxu1 %vm275_vm0, %v3194_v11 }
  0x13   :  { %2952 = vmatprep.mubr.msk.bf16.mxu0 %vm275_vm0, %v3181_v6  ;;  %2984 = vmatprep.mubr.msk.bf16.mxu1 %vm275_vm0, %v3197_v12 }
  0x1a   :  { %2953 = vmatmul.mubr.msk.bf16.gmra.mrb[8].mxu0 %vm275_vm0, %v3182_v10  ;;  %2985 = vmatmul.mubr.msk.bf16.gmra.mrb[8].mxu1 %vm275_vm0, %v3198_v15 }
  0x1b   :  { %2956 = vmatprep.mubr.msk.bf16.mxu0 %vm275_vm0, %v3183_v13  ;;  %2988 = vmatprep.mubr.msk.bf16.mxu1 %vm275_vm0, %v3199_v16 }
  0x22   :  { %2957 = vmatmul.mubr.msk.bf16.gmra.mrb[12].mxu0 %vm275_vm0, %v3184_v14  ;;  %2989 = vmatmul.mubr.msk.bf16.gmra.mrb[12].mxu1 %vm275_vm0, %v3200_v21 }
  0x23   :  { %2960 = vmatprep.mubr.msk.bf16.mxu0 %vm275_vm0, %v3185_v17  ;;  %2992 = vmatprep.mubr.msk.bf16.mxu1 %vm275_vm0, %v3201_v23 }
  0x2a   :  { %2961 = vmatmul.mubr.msk.bf16.gmra.mrb[16].mxu0 %vm275_vm0, %v3186_v20 }
  0x2b   :  { %2964 = vmatprep.mubr.msk.bf16.mxu0 %vm275_vm0, %v3187_v22 }
  0x2c   :  { %12 = vsyncpa [#allocation3], 0  ;;  %v3191_v29 = vld [vmem:[%s5154_s0 + $0x60] sm:$0xff]   ;;  %3013 = vmatpush3.bf16.msra.mxu1 %v3211_v24  ;;  %v3204_v31 = vld [vmem:[%s5154_s0 + $0xd8] sm:$0xff]  }
  0x2d   :  { %3014 = vmatprep.subr.bf16.mxu1 %v3212_v25  ;;  %v3213_v30 = vld [vmem:[%s5157_s3 + $0x20] sm:$0xff]   ;;  %2993 = vmatmul.mubr.msk.bf16.gmra.mrb[16].mxu1 %vm275_vm0, %v3202_v26  ;;  %v3192_v32 = vld [vmem:[%s5154_s0 + $0x68] sm:$0xff]   ;;  %v3195_v34 = vld [vmem:[%s5154_s0 + $0x70] sm:$0xff]  }
  0x2e   :  { %2996 = vmatprep.mubr.msk.bf16.mxu1 %vm275_vm0, %v3203_v28  ;;  %v3205_v33 = vld [vmem:[%s5154_s0 + $0xe0] sm:$0xff]   ;;  %v3206_v35 = vld [vmem:[%s5154_s0 + $0xe8] sm:$0xff]   ;;  %v3196_v36 = vld [vmem:[%s5154_s0 + $0x78] sm:$0xff]  }
  0x2f   :  { %v3207_v37 = vld [vmem:[%s5154_s0 + $0xf0] sm:$0xff]   ;;  %v3208_v38 = vld [vmem:[%s5154_s0 + $0xf8] sm:$0xff]   ;;  %v3214_v39 = vld [vmem:[%s5157_s3 + $0x28] sm:$0xff]  }
  0x30   :  { %3015 = vmatpush3.bf16.msra.mxu1 %v3212_v25  ;;  %v3215_v40 = vld [vmem:[%s5157_s3 + $0x30] sm:$0xff]   ;;  %v3216_v41 = vld [vmem:[%s5157_s3 + $0x38] sm:$0xff]   ;;  %v3839_v42 = vld [vmem:[%s5156_s2] ss:$0 sm:$0xff] }
  0x31   :  { %3016 = vmatprep.subr.bf16.mxu1 %v3213_v30 }
  0x32   :  { %2965 = vmatmul.mubr.msk.bf16.gmra.mrb[20].mxu0 %vm275_vm0, %v3188_v27 }
  0x33   :  { %2968 = vmatprep.mubr.msk.bf16.mxu0 %vm275_vm0, %v3191_v29 }
  0x34   :  { %3017 = vmatpush3.bf16.msra.mxu1 %v3213_v30 }
  0x35   :  { %2997 = vmatmul.mubr.msk.bf16.gmra.mrb[20].mxu1 %vm275_vm0, %v3204_v31  ;;  %3018 = vmatprep.subr.bf16.mxu1 %v3214_v39 }
  0x36   :  { %3000 = vmatprep.mubr.msk.bf16.mxu1 %vm275_vm0, %v3205_v33 }
  0x38   :  { %3019 = vmatpush3.bf16.msra.mxu1 %v3214_v39 }
  0x39   :  { %3020 = vmatprep.subr.bf16.mxu1 %v3215_v40 }
  0x3a   :  { %2969 = vmatmul.mubr.msk.bf16.gmra.mrb[24].mxu0 %vm275_vm0, %v3192_v32 }
  0x3b   :  { %2972 = vmatprep.mubr.msk.bf16.mxu0 %vm275_vm0, %v3195_v34 }
  0x3c   :  { %3021 = vmatpush3.bf16.msra.mxu1 %v3215_v40 }
  0x3d   :  { %3001 = vmatmul.mubr.msk.bf16.gmra.mrb[24].mxu1 %vm275_vm0, %v3206_v35  ;;  %3022 = vmatprep.subr.bf16.mxu1 %v3216_v41 }
  0x3e   :  { %3004 = vmatprep.mubr.msk.bf16.mxu1 %vm275_vm0, %v3207_v37 }
  0x40   :  { %3023 = vmatpush3.bf16.msra.mxu1 %v3216_v41 }
  0x42   :  { %2973 = vmatmul.mubr.msk.bf16.gmra.mrb[28].mxu0 %vm275_vm0, %v3196_v36 }
  0x45   :  { %3005 = vmatmul.mubr.msk.bf16.gmra.mrb[28].mxu1 %vm275_vm0, %v3208_v38 }
  0xdd   :  { %v2946_v43 = vpop.f32.mrb[0].mxu0  ;;  %v3857_v58 = vpop.f32.mrb[0].mxu1 }
  0xde   :  { %v3842_v44 = vadd.f32 %v2946_v43, %v3839_v42  ;;  %v406_v45 = vpop.f32.mrb[1].mxu0  ;;  %v3859_v61 = vpop.f32.mrb[1].mxu1 }
  0xdf   :  { %v3845_v46 = vadd.f32 %v3839_v42, %v406_v45  ;;  %v2947_v47 = vpop.f32.mrb[2].mxu0  ;;  %v3864_v0 = vpop.f32.mrb[2].mxu1 }
  0xe0   :  { %v663_v48 = vmin.f32 %v3842_v44, 0.0  ;;  %v3849_v49 = vadd.f32 %v2947_v47, %v3839_v42  ;;  %v409_v50 = vpop.f32.mrb[3].mxu0  ;;  %v3869_v3 = vpop.f32.mrb[3].mxu1  ;;  %vm983_vm1 = vcmp.gt.f32.partialorder %v3842_v44, 0.0 }
  0xe1   :  { %v661_v51 = vmin.f32 %v3845_v46, 0.0  ;;  %v3853_v52 = vadd.f32 %v3839_v42, %v409_v50  ;;  %vm981_vm2 = vcmp.gt.f32.partialorder %v3845_v46, 0.0 }
  0xe2   :  { %v729_v53 = vmul.f32 1.442695, %v663_v48  ;;  %v664_v54 = vmin.f32 %v3849_v49, 0.0  ;;  %vm984_vm3 = vcmp.gt.f32.partialorder %v3849_v49, 0.0 }
  0xe3   :  { %v725_v55 = vmul.f32 1.442695, %v661_v51  ;;  %v662_v56 = vmin.f32 %v3853_v52, 0.0  ;;  %vm982_vm4 = vcmp.gt.f32.partialorder %v3853_v52, 0.0 }
  0xe4   :  { %3225 = vpow2.f32 %v729_v53  ;;  %v731_v57 = vmul.f32 1.442695, %v664_v54 }
  0xe5   :  { %3227 = vpow2.f32 %v725_v55  ;;  %v727_v59 = vmul.f32 1.442695, %v662_v56  ;;  %v2950_v60 = vpop.f32.mrb[4].mxu0  ;;  %v3881_v14 = vpop.f32.mrb[4].mxu1 }
  0xe6   :  { %3229 = vpow2.f32 %v731_v57  ;;  %v3862_v62 = vadd.f32 %v2950_v60, %v3839_v42  ;;  %v422_v63 = vpop.f32.mrb[5].mxu0  ;;  %v3883_v17 = vpop.f32.mrb[5].mxu1 }
  0xe7   :  { %3231 = vpow2.f32 %v727_v59  ;;  %v3867_v1 = vadd.f32 %v3839_v42, %v422_v63  ;;  %v2951_v2 = vpop.f32.mrb[6].mxu0  ;;  %v3888_v21 = vpop.f32.mrb[6].mxu1 }
  0xe8   :  { %v667_v4 = vmin.f32 %v3862_v62, 0.0  ;;  %v3873_v5 = vadd.f32 %v2951_v2, %v3839_v42  ;;  %v425_v6 = vpop.f32.mrb[7].mxu0  ;;  %v3890_v25 = vpop.f32.mrb[7].mxu1  ;;  %v3928_v2 = vadd.f32 %v3857_v58, %v3839_v42  ;;  %vm987_vm5 = vcmp.gt.f32.partialorder %v3862_v62, 0.0 }
  0xe9   :  { %v665_v7 = vmin.f32 %v3867_v1, 0.0  ;;  %v3877_v8 = vadd.f32 %v3839_v42, %v425_v6  ;;  %vm985_vm6 = vcmp.gt.f32.partialorder %v3867_v1, 0.0 }
  0xea   :  { %v737_v9 = vmul.f32 1.442695, %v667_v4  ;;  %v668_v10 = vmin.f32 %v3873_v5, 0.0  ;;  %vm988_vm8 = vcmp.gt.f32.partialorder %v3873_v5, 0.0  ;;  %vm1015_vm0 = vcmp.gt.f32.partialorder %v3928_v2, 0.0 }
  0xeb   :  { %v733_v11 = vmul.f32 1.442695, %v665_v7  ;;  %v666_v12 = vmin.f32 %v3877_v8, 0.0  ;;  %vm986_vm7 = vcmp.gt.f32.partialorder %v3877_v8, 0.0 }
  0xec   :  { %3233 = vpow2.f32 %v737_v9  ;;  %v739_v13 = vmul.f32 1.442695, %v668_v10 }
  0xed   :  { %3235 = vpow2.f32 %v733_v11  ;;  %v735_v15 = vmul.f32 1.442695, %v666_v12  ;;  %v2954_v16 = vpop.f32.mrb[8].mxu0  ;;  %v3905_v41 = vpop.f32.mrb[8].mxu1 }
  0xee   :  { %v3226_v18 = vpop.eup %3225  ;;  %3237 = vpow2.f32 %v739_v13  ;;  %v3886_v19 = vadd.f32 %v2954_v16, %v3839_v42  ;;  %v438_v20 = vpop.f32.mrb[9].mxu0 }
  0xef   :  { %v3228_v22 = vpop.eup %3227  ;;  %v2682_v23 = vadd.f32 -1.0, %v3226_v18  ;;  %3239 = vpow2.f32 %v735_v15  ;;  %v2955_v24 = vpop.f32.mrb[10].mxu0  ;;  %v3893_v27 = vadd.f32 %v3839_v42, %v438_v20 }
  0xf0   :  { %v3230_v26 = vpop.eup %3229  ;;  %v3896_v28 = vadd.f32 %v2955_v24, %v3839_v42  ;;  %v441_v29 = vpop.f32.mrb[11].mxu0  ;;  %v2680_v32 = vadd.f32 -1.0, %v3228_v22  ;;  %v671_v34 = vmin.f32 %v3886_v19, 0.0  ;;  %vm991_vm9 = vcmp.gt.f32.partialorder %v3886_v19, 0.0 }
  0xf1   :  { %v3232_v30 = vpop.eup %3231  ;;  %v919_v31 = vmul.f32 1.6732632, %v2682_v23  ;;  %v2683_v33 = vadd.f32 -1.0, %v3230_v26  ;;  %v669_v40 = vmin.f32 %v3893_v27, 0.0  ;;  %v3908_v50 = vpop.f32.mrb[9].mxu1  ;;  %v3915_v54 = vadd.f32 %v3839_v42, %v441_v29 }
  0xf2   :  { %v2681_v35 = vadd.f32 -1.0, %v3232_v30  ;;  %v672_v38 = vmin.f32 %v3896_v28, 0.0  ;;  %v917_v43 = vmul.f32 1.6732632, %v2680_v32  ;;  %v745_v47 = vmul.f32 1.442695, %v671_v34 }
  0xf3   :  { %v1047_v36 = vsel %vm983_vm1, %v3842_v44, %v919_v31  ;;  %v920_v37 = vmul.f32 1.6732632, %v2683_v33  ;;  %v3920_v57 = vpop.f32.mrb[10].mxu1  ;;  %v670_v11 = vmin.f32 %v3915_v54, 0.0  ;;  %v741_v58 = vmul.f32 1.442695, %v669_v40 }
  0xf4   :  { %v918_v39 = vmul.f32 1.6732632, %v2681_v35  ;;  %v3910_v51 = vmul.f32 1.050701, %v1047_v36  ;;  %v3930_v4 = vpop.f32.mrb[11].mxu1  ;;  %v1045_v15 = vsel %vm981_vm2, %v3845_v46, %v917_v43  ;;  %3241 = vpow2.f32 %v745_v47 }
  0xf5   :  { %v1048_v45 = vsel %vm984_vm3, %v3849_v49, %v920_v37  ;;  %v2958_v48 = vpop.f32.mrb[12].mxu0  ;;  %v747_v49 = vmul.f32 1.442695, %v672_v38  ;;  %v743_v22 = vmul.f32 1.442695, %v670_v11  ;;  %v3943_v26 = vadd.f32 %v3839_v42, %v3859_v61  ;;  %v3946_v31 = vpop.f32.mrb[12].mxu1 }
  0xf6   :  { %v3234_v44 = vpop.eup %3233  ;;  %v3912_v53 = vmul.f32 1.050701, %v1048_v45  ;;  %v3918_v55 = vadd.f32 %v2958_v48, %v3839_v42  ;;  %v454_v56 = vpop.f32.mrb[13].mxu0  ;;  %v1046_v9 = vsel %vm982_vm4, %v3853_v52, %v918_v39  ;;  %v1109_v29 = vmul.f32 1.050701, %v1045_v15 }
  0xf7   :  { %v3236_v59 = vpop.eup %3235  ;;  %v3924_v60 = vadd.f32 %v3839_v42, %v454_v56  ;;  %v2959_v63 = vpop.f32.mrb[14].mxu0  ;;  %v2686_v10 = vadd.f32 -1.0, %v3234_v44  ;;  %v1110_v24 = vmul.f32 1.050701, %v1046_v9  ;;  %3243 = vpow2.f32 %v747_v49 }
  0xf8   :  { %v3238_v6 = vpop.eup %3237  ;;  %v1174_v7 = vpack.c.bf16 %v3912_v53, %v3910_v51  ;;  %v457_v12 = vpop.f32.mrb[15].mxu0  ;;  %v675_v16 = vmin.f32 %v3918_v55, 0.0  ;;  %v2684_v52 = vadd.f32 -1.0, %v3236_v59  ;;  %3245 = vpow2.f32 %v743_v22 }
  0xf9   :  { %v3240_v13 = vpop.eup %3239  ;;  %v2687_v18 = vadd.f32 -1.0, %v3238_v6  ;;  %v673_v23 = vmin.f32 %v3924_v60, 0.0  ;;  %v923_v30 = vmul.f32 1.6732632, %v2686_v10  ;;  %v695_v46 = vmin.f32 %v3928_v2, 0.0  ;;  %v3948_v35 = vpop.f32.mrb[13].mxu1 }
  0xfa   :  { %v2685_v20 = vadd.f32 -1.0, %v3240_v13  ;;  %3247 = vpow2.f32 %v741_v58  ;;  %v753_v33 = vmul.f32 1.442695, %v675_v16  ;;  %v3951_v38 = vadd.f32 %v2959_v63, %v3839_v42  ;;  %v3956_v40 = vpop.f32.mrb[14].mxu1 }
  0xfb   :  { %v924_v36 = vmul.f32 1.6732632, %v2687_v18  ;;  %v749_v37 = vmul.f32 1.442695, %v673_v23  ;;  %v3954_v61 = vadd.f32 %v3839_v42, %v457_v12  ;;  %v921_v43 = vmul.f32 1.6732632, %v2684_v52 }
  0xfc   :  { %v922_v32 = vmul.f32 1.6732632, %v2685_v20  ;;  %v1173_v45 = vpack.c.bf16 %v1110_v24, %v1109_v29  ;;  %v693_v48 = vmin.f32 %v3943_v26, 0.0  ;;  %v3960_v44 = vpop.f32.mrb[15].mxu1  ;;  %v676_v51 = vmin.f32 %v3951_v38, 0.0 }
  0xfd   :  { %v2962_v34 = vpop.f32.mrb[16].mxu0  ;;  %v674_v53 = vmin.f32 %v3954_v61, 0.0  ;;  %3249 = vpow2.f32 %v753_v33  ;;  %v1051_v63 = vsel %vm987_vm5, %v3862_v62, %v923_v30  ;;  %v1052_v6 = vsel %vm988_vm8, %v3873_v5, %v924_v36 }
  0xfe   :  { %v470_v39 = vpop.f32.mrb[17].mxu0  ;;  %v1050_v59 = vsel %vm986_vm7, %v3877_v8, %v922_v32  ;;  %3024 = vmatprep.mubr.bf16.mxu1 %v1173_v45  ;;  %v3969_v49 = vadd.f32 %v2962_v34, %v3839_v42  ;;  %3251 = vpow2.f32 %v749_v37  ;;  %v755_v9 = vmul.f32 1.442695, %v676_v51  ;;  %v3242_v10 = vpop.eup %3241 }
  0xff   :  { %v2963_v47 = vpop.f32.mrb[18].mxu0  ;;  %3025 = vmatmul.mubr.bf16.vlgmr.msra.gmra.mrb[32].mxu1 %v1174_v7  ;;  %v1049_v11 = vsel %vm985_vm6, %v3867_v1, %v921_v43  ;;  %v751_v8 = vmul.f32 1.442695, %v674_v53  ;;  %v3980_v13 = vadd.f32 %v3839_v42, %v470_v39  ;;  %v1114_v15 = vmul.f32 1.050701, %v1050_v59 }
 0x100   :  { %v473_v56 = vpop.f32.mrb[19].mxu0  ;;  %v679_v12 = vmin.f32 %v3969_v49, 0.0  ;;  %v3983_v58 = vadd.f32 %v2963_v47, %v3839_v42  ;;  %v793_v62 = vmul.f32 1.442695, %v695_v46  ;;  %v3985_v5 = vpop.f32.mrb[16].mxu1  ;;  %v3991_v1 = vadd.f32 %v3864_v0, %v3839_v42 }
 0x101   :  { %v3244_v16 = vpop.eup %3243  ;;  %v1116_v7 = vmul.f32 1.050701, %v1052_v6  ;;  %v3987_v20 = vmul.f32 1.442695, %v693_v48  ;;  %v1115_v23 = vmul.f32 1.050701, %v1051_v63  ;;  %3253 = vpow2.f32 %v755_v9 }
 0x102   :  { %v3246_v22 = vpop.eup %3245  ;;  %v1113_v24 = vmul.f32 1.050701, %v1049_v11  ;;  %v3995_v29 = vadd.f32 %v3839_v42, %v3869_v3  ;;  %v3997_v30 = vpop.f32.mrb[17].mxu1  ;;  %3255 = vpow2.f32 %v751_v8  ;;  %v761_v33 = vmul.f32 1.442695, %v679_v12 }
 0x103   :  { %v2689_v32 = vadd.f32 -1.0, %v3246_v22  ;;  %v677_v34 = vmin.f32 %v3980_v13, 0.0  ;;  %v2690_v0 = vadd.f32 -1.0, %v3242_v10  ;;  %v680_v37 = vmin.f32 %v3983_v58, 0.0  ;;  %v4004_v47 = vpop.f32.mrb[18].mxu1 }
 0x104   :  { %v3248_v46 = vpop.eup %3247  ;;  %v4002_v39 = vadd.f32 %v3839_v42, %v473_v56  ;;  %v1175_v43 = vpack.c.bf16 %v1114_v15, %v1113_v24  ;;  %v2691_v3 = vadd.f32 -1.0, %v3244_v16  ;;  %v1176_v48 = vpack.c.bf16 %v1116_v7, %v1115_v23  ;;  %v4009_v53 = vpop.f32.mrb[19].mxu1 }
 0x105   :  { %v2966_v18 = vpop.f32.mrb[20].mxu0  ;;  %3257 = vpow2.f32 %v793_v62  ;;  %v2688_v59 = vadd.f32 -1.0, %v3248_v46  ;;  %vm989_vm10 = vcmp.gt.f32.partialorder %v3893_v27, 0.0  ;;  %v926_v9 = vmul.f32 1.6732632, %v2689_v32 }
 0x106   :  { %v486_v52 = vpop.f32.mrb[21].mxu0  ;;  %v4007_v51 = vadd.f32 %v2966_v18, %v3839_v42  ;;  %3028 = vmatprep.mubr.bf16.mxu1 %v1175_v43  ;;  %3259 = vpow2.f32 %v761_v33  ;;  %v757_v10 = vmul.f32 1.442695, %v677_v34  ;;  %v927_v8 = vmul.f32 1.6732632, %v2690_v0 }
 0x107   :  { %v2967_v36 = vpop.f32.mrb[22].mxu0  ;;  %v3250_v6 = vpop.eup %3249  ;;  %3029 = vmatmul.mubr.bf16.gmra.mrb[36].mxu1 %v1176_v48  ;;  %vm992_vm11 = vcmp.gt.f32.partialorder %v3896_v28, 0.0  ;;  %v763_v12 = vmul.f32 1.442695, %v680_v37  ;;  %v678_v15 = vmin.f32 %v4002_v39, 0.0  ;;  %v4019_v7 = vadd.f32 %v3839_v42, %v486_v52 }
 0x108   :  { %v489_v45 = vpop.f32.mrb[23].mxu0  ;;  %v3252_v11 = vpop.eup %3251  ;;  %v928_v62 = vmul.f32 1.6732632, %v2691_v3  ;;  %v683_v16 = vmin.f32 %v4007_v51, 0.0  ;;  %v4022_v18 = vadd.f32 %v2967_v36, %v3839_v42  ;;  %v925_v24 = vmul.f32 1.6732632, %v2688_v59 }
 0x109   :  { %v4026_v23 = vpop.f32.mrb[20].mxu1  ;;  %vm990_vm12 = vcmp.gt.f32.partialorder %v3915_v54, 0.0  ;;  %v2694_v46 = vadd.f32 -1.0, %v3250_v6  ;;  %v2692_v0 = vadd.f32 -1.0, %v3252_v11  ;;  %3261 = vpow2.f32 %v757_v10 }
 0x10a   :  { %5162 = vst [vmem:[#allocation5_spill] sm:$0xff] %v4026_v23  ;;  %v4031_v33 = vpop.f32.mrb[21].mxu1  ;;  %v1054_v34 = vsel %vm990_vm12, %v3915_v54, %v926_v9  ;;  %v681_v52 = vmin.f32 %v4019_v7, 0.0  ;;  %vm995_vm13 = vcmp.gt.f32.partialorder %v3918_v55, 0.0  ;;  %3263 = vpow2.f32 %v763_v12 }
 0x10b   :  { %5163 = vst [vmem:[#allocation6_spill] sm:$0xff] %v4031_v33  ;;  %v4037_v37 = vpop.f32.mrb[22].mxu1  ;;  %v3254_v43 = vpop.eup %3253  ;;  %v759_v3 = vmul.f32 1.442695, %v678_v15  ;;  %v684_v48 = vmin.f32 %v4022_v18, 0.0  ;;  %v1056_v9 = vsel %vm992_vm11, %v3896_v28, %v928_v62  ;;  %vm993_vm14 = vcmp.gt.f32.partialorder %v3924_v60, 0.0 }
 0x10c   :  { %5164 = vst [vmem:[#allocation7_spill] sm:$0xff] %v4037_v37  ;;  %v4043_v6 = vpop.f32.mrb[23].mxu1  ;;  %v3256_v54 = vpop.eup %3255  ;;  %v769_v10 = vmul.f32 1.442695, %v683_v16  ;;  %v4050_v11 = vadd.f32 %v3839_v42, %v489_v45  ;;  %v1053_v12 = vsel %vm989_vm10, %v3893_v27, %v925_v24  ;;  %v1118_v15 = vmul.f32 1.050701, %v1054_v34 }
 0x10d   :  { %v4024_v22 = vpop.f32.mrb[24].mxu0  ;;  %5165 = vst [vmem:[#allocation8_spill] sm:$0xff] %v4043_v6  ;;  %v931_v56 = vmul.f32 1.6732632, %v2694_v46  ;;  %vm996_vm15 = vcmp.gt.f32.partialorder %v3951_v38, 0.0  ;;  %v1055_v6 = vsel %vm991_vm9, %v3886_v19, %v927_v8  ;;  %v2695_v62 = vadd.f32 -1.0, %v3254_v43 }
 0x10e   :  { %v4029_v32 = vpop.f32.mrb[25].mxu0  ;;  %v929_v28 = vmul.f32 1.6732632, %v2692_v0  ;;  %v765_v37 = vmul.f32 1.442695, %v681_v52  ;;  %v2693_v16 = vadd.f32 -1.0, %v3256_v54  ;;  %3265 = vpow2.f32 %v759_v3 }
 0x10f   :  { %v4035_v36 = vpop.f32.mrb[26].mxu0  ;;  %v3258_v63 = vpop.eup %3257  ;;  %v1120_v45 = vmul.f32 1.050701, %v1056_v9  ;;  %v771_v33 = vmul.f32 1.442695, %v684_v48  ;;  %vm994_vm1 = vcmp.gt.f32.partialorder %v3954_v61, 0.0  ;;  %3267 = vpow2.f32 %v769_v10 }
 0x110   :  { %v4041_v59 = vpop.f32.mrb[27].mxu0  ;;  %v4060_v23 = vpop.f32.mrb[24].mxu1  ;;  %v1117_v24 = vmul.f32 1.050701, %v1053_v12  ;;  %v682_v46 = vmin.f32 %v4050_v11, 0.0  ;;  %v1059_v8 = vsel %vm995_vm13, %v3918_v55, %v931_v56  ;;  %v2714_v0 = vadd.f32 -1.0, %v3258_v63 }
 0x111   :  { %v3260_v27 = vpop.eup %3259  ;;  %v1119_v19 = vmul.f32 1.050701, %v1055_v6  ;;  %3269 = vpow2.f32 %v3987_v20  ;;  %v1057_v52 = vsel %vm993_vm14, %v3924_v60, %v929_v28  ;;  %v932_v43 = vmul.f32 1.6732632, %v2695_v62  ;;  %v4076_v10 = vpop.f32.mrb[25].mxu1 }
 0x112   :  { %3271 = vpow2.f32 %v765_v37  ;;  %v1177_v3 = vpack.c.bf16 %v1118_v15, %v1117_v24  ;;  %v930_v48 = vmul.f32 1.6732632, %v2693_v16  ;;  %v2698_v54 = vadd.f32 -1.0, %v3260_v27  ;;  %v4082_v60 = vpop.f32.mrb[26].mxu1 }
 0x113   :  { %vm999_vm2 = vcmp.gt.f32.partialorder %v3969_v49, 0.0  ;;  %3273 = vpow2.f32 %v771_v33  ;;  %v1178_v6 = vpack.c.bf16 %v1120_v45, %v1119_v19  ;;  %v3262_v55 = vpop.eup %3261  ;;  %v4078_v63 = vmul.f32 1.050701, %v1059_v8  ;;  %v4096_v16 = vpop.f32.mrb[27].mxu1 }
 0x114   :  { %v767_v20 = vmul.f32 1.442695, %v682_v46  ;;  %3032 = vmatprep.mubr.bf16.mxu1 %v1177_v3  ;;  %v3264_v37 = vpop.eup %3263  ;;  %v951_v12 = vmul.f32 1.6732632, %v2714_v0  ;;  %v5166_v15 = vmin.f32 %v3991_v1, 0.0  ;;  %v4088_v33 = vadd.f32 %v4024_v22, %v3839_v42  ;;  %5167 = vst [vmem:[#allocation9_spill] sm:$0xff] %v4096_v16 }
 0x115   :  { %v4064_v34 = vpop.f32.mrb[28].mxu0  ;;  %3033 = vmatmul.mubr.bf16.gmra.mrb[40].mxu1 %v1178_v6  ;;  %v4092_v62 = vadd.f32 %v3881_v14, %v3839_v42  ;;  %v4098_v27 = vmul.f32 1.050701, %v1057_v52  ;;  %v1060_v24 = vsel %vm996_vm15, %v3951_v38, %v932_v43  ;;  %vm997_vm3 = vcmp.gt.f32.partialorder %v3980_v13, 0.0 }
 0x116   :  { %v4074_v9 = vpop.f32.mrb[29].mxu0  ;;  %v795_v28 = vmul.f32 1.442695, %v5166_v15  ;;  %v4106_v22 = vadd.f32 %v3839_v42, %v4029_v32  ;;  %v4110_v14 = vadd.f32 %v4035_v36, %v3839_v42  ;;  %v1058_v46 = vsel %vm994_vm1, %v3954_v61, %v930_v48 }
 0x117   :  { %v4080_v56 = vpop.f32.mrb[30].mxu0  ;;  %v935_v19 = vmul.f32 1.6732632, %v2698_v54  ;;  %v2696_v8 = vadd.f32 -1.0, %v3262_v55  ;;  %v687_v0 = vmin.f32 %v4088_v33, 0.0  ;;  %v2699_v38 = vadd.f32 -1.0, %v3264_v37 }
 0x118   :  { %v4094_v45 = vpop.f32.mrb[31].mxu0  ;;  %v4116_v52 = vpop.f32.mrb[28].mxu1  ;;  %3275 = vpow2.f32 %v767_v20  ;;  %v5169_v43 = vmin.f32 %v3995_v29, 0.0  ;;  %v685_v3 = vmin.f32 %v4106_v22, 0.0  ;;  %v4123_v15 = vmul.f32 1.050701, %v1060_v24 }
 0x119   :  { %5168 = vst [vmem:[#allocation10_spill] sm:$0xff] %v4116_v52  ;;  %v4121_v6 = vpop.f32.mrb[29].mxu1  ;;  %v3266_v36 = vpop.eup %3265  ;;  %v1079_v61 = vsel %vm1015_vm0, %v3928_v2, %v951_v12  ;;  %3277 = vpow2.f32 %v795_v28  ;;  %v688_v48 = vmin.f32 %v4110_v14, 0.0  ;;  %v777_v20 = vmul.f32 1.442695, %v687_v0 }
 0x11a   :  { %v791_v32 = vmul.f32 1.442695, %v5169_v43  ;;  %5170 = vst [vmem:[#allocation11_spill] sm:$0xff] %v4121_v6  ;;  %v4129_v54 = vpop.f32.mrb[30].mxu1  ;;  %v3268_v55 = vpop.eup %3267  ;;  %v773_v37 = vmul.f32 1.442695, %v685_v3  ;;  %v4134_v6 = vadd.f32 %v3839_v42, %v4041_v59  ;;  %v1063_v28 = vsel %vm999_vm2, %v3969_v49, %v935_v19 }
 0x11b   :  { %5171 = vst [vmem:[#allocation12_spill] sm:$0xff] %v4129_v54  ;;  %v699_v43 = vmin.f32 %v4092_v62, 0.0  ;;  %v3270_v24 = vpop.eup %3269  ;;  %v4136_v52 = vmul.f32 1.050701, %v1058_v46  ;;  %v933_v16 = vmul.f32 1.6732632, %v2696_v8 }
 0x11c   :  { %vm1000_vm4 = vcmp.gt.f32.partialorder %v3983_v58, 0.0  ;;  %v4139_v2 = vpop.f32.mrb[31].mxu1  ;;  %v3272_v12 = vpop.eup %3271  ;;  %v936_v0 = vmul.f32 1.6732632, %v2699_v38  ;;  %v2697_v3 = vadd.f32 -1.0, %v3266_v36  ;;  %vm1013_vm5 = vcmp.gt.f32.partialorder %v3943_v26, 0.0 }
 0x11d   :  { %5172 = vst [vmem:[#allocation13_spill] sm:$0xff] %v4139_v2  ;;  %3279 = vpow2.f32 %v791_v32  ;;  %v3217_v59 = vld [vmem:[%s5159_s5] sm:$0xff]   ;;  %v3274_v46 = vpop.eup %3273  ;;  %vm998_vm6 = vcmp.gt.f32.partialorder %v4002_v39, 0.0  ;;  %v4149_v8 = vmul.f32 1.050701, %v1079_v61  ;;  %v3218_v49 = vld [vmem:[%s5159_s5 + $0x8] sm:$0xff]   ;;  %v1061_v61 = vsel %vm997_vm3, %v3980_v13, %v933_v16 }
 0x11e   :  { %3281 = vpow2.f32 %v777_v20  ;;  %v779_v2 = vmul.f32 1.442695, %v688_v48  ;;  %v2702_v19 = vadd.f32 -1.0, %v3268_v55  ;;  %vm1003_vm7 = vcmp.gt.f32.partialorder %v4007_v51, 0.0  ;;  %3088 = vmatprep.subr.bf16.mxu0 %v3217_v59 }
 0x11f   :  { %5173 = vst [vmem:[#allocation14_spill] sm:$0xff] %v4149_v8  ;;  %vm1001_vm8 = vcmp.gt.f32.partialorder %v4019_v7, 0.0  ;;  %3283 = vpow2.f32 %v773_v37  ;;  %v801_v38 = vmul.f32 1.442695, %v699_v43  ;;  %v686_v32 = vmin.f32 %v4134_v6, 0.0  ;;  %3089 = vmatpush3.bf16.msra.mxu0 %v3217_v59  ;;  %v3219_v43 = vld [vmem:[%s5159_s5 + $0x10] sm:$0xff]  }
 0x120   :  { %v4157_v36 = vmul.f32 1.050701, %v1063_v28  ;;  %v2700_v48 = vadd.f32 -1.0, %v3272_v12  ;;  %v2712_v20 = vadd.f32 -1.0, %v3270_v24  ;;  %v1064_v55 = vsel %vm1000_vm4, %v3983_v58, %v936_v0  ;;  %3090 = vmatprep.subr.bf16.mxu0 %v3218_v49 }
 0x121   :  { %v934_v54 = vmul.f32 1.6732632, %v2697_v3  ;;  %v2703_v8 = vadd.f32 -1.0, %v3274_v46  ;;  %v4167_v37 = vadd.f32 %v3839_v42, %v3883_v17  ;;  %vm1004_vm9 = vcmp.gt.f32.partialorder %v4022_v18, 0.0 }
 0x122   :  { %3285 = vpow2.f32 %v779_v2  ;;  %v775_v13 = vmul.f32 1.442695, %v686_v32  ;;  %v4175_v16 = vadd.f32 %v3888_v21, %v3839_v42  ;;  %v4179_v58 = vadd.f32 %v3839_v42, %v3890_v25  ;;  %v3276_v24 = vpop.eup %3275 }
 0x123   :  { %v4181_v17 = vmul.f32 1.050701, %v1061_v61  ;;  %v939_v12 = vmul.f32 1.6732632, %v2702_v19  ;;  %3287 = vpow2.f32 %v801_v38  ;;  %v697_v28 = vmin.f32 %v4167_v37, 0.0  ;;  %v3278_v0 = vpop.eup %3277  ;;  %3091 = vmatpush3.bf16.msra.mxu0 %v3218_v49  ;;  %v3220_v19 = vld [vmem:[%s5159_s5 + $0x18] sm:$0xff]  }
 0x124   :  { %v937_v3 = vmul.f32 1.6732632, %v2700_v48  ;;  %v949_v59 = vmul.f32 1.6732632, %v2712_v20  ;;  %vm1016_vm10 = vcmp.gt.f32.partialorder %v3991_v1, 0.0  ;;  %3289 = vpow2.f32 %v775_v13  ;;  %3092 = vmatprep.subr.bf16.mxu0 %v3219_v43 }
 0x125   :  { %v700_v21 = vmin.f32 %v4175_v16, 0.0  ;;  %v4186_v2 = vmul.f32 1.050701, %v1064_v55  ;;  %v1062_v25 = vsel %vm998_vm6, %v4002_v39, %v934_v54  ;;  %vm1002_vm11 = vcmp.gt.f32.partialorder %v4050_v11, 0.0 }
 0x126   :  { %v797_v46 = vmul.f32 1.442695, %v697_v28  ;;  %v940_v38 = vmul.f32 1.6732632, %v2703_v8  ;;  %v2701_v32 = vadd.f32 -1.0, %v3276_v24  ;;  %v698_v48 = vmin.f32 %v4179_v58, 0.0 }
 0x127   :  { %v803_v61 = vmul.f32 1.442695, %v700_v21  ;;  %v3280_v49 = vpop.eup %3279  ;;  %v2715_v20 = vadd.f32 -1.0, %v3278_v0  ;;  %v1179_v55 = vpack.c.bf16 %v4136_v52, %v4098_v27  ;;  %v1180_v39 = vpack.c.bf16 %v4123_v15, %v4078_v63  ;;  %3093 = vmatpush3.bf16.msra.mxu0 %v3219_v43 }
 0x128   :  { %v4202_v54 = vadd.f32 %v4064_v34, %v3839_v42  ;;  %v3282_v13 = vpop.eup %3281  ;;  %v1067_v8 = vsel %vm1003_vm7, %v4007_v51, %v939_v12  ;;  %v1065_v24 = vsel %vm1001_vm8, %v4019_v7, %v937_v3  ;;  %v1077_v27 = vsel %vm1013_vm5, %v3943_v26, %v949_v59  ;;  %3094 = vmatprep.subr.bf16.mxu0 %v3220_v19  ;;  %v3221_v26 = vld [vmem:[%s5159_s5 + $0x20] sm:$0xff]  }
 0x129   :  { %vm1014_vm12 = vcmp.gt.f32.partialorder %v3995_v29, 0.0  ;;  %v4216_v63 = vadd.f32 %v3839_v42, %v4074_v9  ;;  %v3284_v34 = vpop.eup %3283  ;;  %3291 = vpow2.f32 %v797_v46  ;;  %v799_v52 = vmul.f32 1.442695, %v698_v48  ;;  %3036 = vmatprep.mubr.bf16.mxu1 %v1179_v55 }
 0x12a   :  { %v691_v51 = vmin.f32 %v4202_v54, 0.0  ;;  %v4221_v7 = vadd.f32 %v4080_v56, %v3839_v42  ;;  %v938_v15 = vmul.f32 1.6732632, %v2701_v32  ;;  %v2713_v12 = vadd.f32 -1.0, %v3280_v49  ;;  %3037 = vmatmul.mubr.bf16.gmra.mrb[44].mxu1 %v1180_v39 }
 0x12b   :  { %vm1007_vm13 = vcmp.gt.f32.partialorder %v4088_v33, 0.0  ;;  %3293 = vpow2.f32 %v803_v61  ;;  %v689_v9 = vmin.f32 %v4216_v63, 0.0  ;;  %v1068_v43 = vsel %vm1004_vm9, %v4022_v18, %v940_v38  ;;  %3095 = vmatpush3.bf16.msra.mxu0 %v3220_v19 }
 0x12c   :  { %v952_v28 = vmul.f32 1.6732632, %v2715_v20  ;;  %v2706_v56 = vadd.f32 -1.0, %v3282_v13  ;;  %vm1005_vm14 = vcmp.gt.f32.partialorder %v4106_v22, 0.0  ;;  %v785_v0 = vmul.f32 1.442695, %v691_v51  ;;  %v3286_v3 = vpop.eup %3285  ;;  %3096 = vmatprep.subr.bf16.mxu0 %v3221_v26 }
 0x12d   :  { %v1126_v59 = vmul.f32 1.050701, %v1062_v25  ;;  %v2704_v21 = vadd.f32 -1.0, %v3284_v34  ;;  %v781_v46 = vmul.f32 1.442695, %v689_v9  ;;  %v692_v32 = vmin.f32 %v4221_v7, 0.0  ;;  %v3288_v61 = vpop.eup %3287 }
 0x12e   :  { %v4233_v48 = vmul.f32 1.050701, %v1067_v8  ;;  %v4235_v49 = vmul.f32 1.050701, %v1065_v24  ;;  %v4237_v55 = vmul.f32 1.050701, %v1077_v27  ;;  %3295 = vpow2.f32 %v799_v52  ;;  %v3290_v18 = vpop.eup %3289 }
 0x12f   :  { %v4239_v38 = vmul.f32 1.050701, %v1068_v43  ;;  %v1066_v25 = vsel %vm1002_vm11, %v4050_v11, %v938_v15  ;;  %v950_v20 = vmul.f32 1.6732632, %v2713_v12  ;;  %vm1019_vm15 = vcmp.gt.f32.partialorder %v4092_v62, 0.0  ;;  %3097 = vmatpush3.bf16.msra.mxu0 %v3221_v26 }
 0x130   :  { %v787_v19 = vmul.f32 1.442695, %v692_v32  ;;  %v1080_v39 = vsel %vm1016_vm10, %v3991_v1, %v952_v28  ;;  %v943_v13 = vmul.f32 1.6732632, %v2706_v56  ;;  %v2707_v8 = vadd.f32 -1.0, %v3286_v3 }
 0x131   :  { %3297 = vpow2.f32 %v785_v0  ;;  %v941_v24 = vmul.f32 1.6732632, %v2704_v21  ;;  %vm1008_vm0 = vcmp.gt.f32.partialorder %v4110_v14, 0.0  ;;  %v4251_v27 = vadd.f32 %v3905_v41, %v3839_v42 }
 0x132   :  { %3299 = vpow2.f32 %v781_v46  ;;  %v4255_v11 = vadd.f32 %v3839_v42, %v4094_v45  ;;  %v4257_v34 = vmul.f32 1.050701, %v1066_v25  ;;  %v2718_v52 = vadd.f32 -1.0, %v3288_v61 }
 0x133   :  { %v2705_v1 = vadd.f32 -1.0, %v3290_v18  ;;  %vm1006_vm1 = vcmp.gt.f32.partialorder %v4134_v6, 0.0  ;;  %v4262_v51 = vadd.f32 %v3839_v42, %v3908_v50  ;;  %3301 = vpow2.f32 %v787_v19  ;;  %v3292_v26 = vpop.eup %3291 }
 0x134   :  { %v703_v15 = vmin.f32 %v4251_v27, 0.0  ;;  %v690_v41 = vmin.f32 %v4255_v11, 0.0  ;;  %v4268_v45 = vadd.f32 %v3920_v57, %v3839_v42  ;;  %v4270_v12 = vmul.f32 1.050701, %v1080_v39 }
 0x135   :  { %v1078_v9 = vsel %vm1014_vm12, %v3995_v29, %v950_v20  ;;  %v1071_v50 = vsel %vm1007_vm13, %v4088_v33, %v943_v13  ;;  %v701_v43 = vmin.f32 %v4262_v51, 0.0  ;;  %v3294_v28 = vpop.eup %3293  ;;  %v1069_v56 = vsel %vm1005_vm14, %v4106_v22, %v941_v24 }
 0x136   :  { %v944_v57 = vmul.f32 1.6732632, %v2707_v8  ;;  %vm1017_vm2 = vcmp.gt.f32.partialorder %v4167_v37, 0.0  ;;  %v809_v0 = vmul.f32 1.442695, %v703_v15  ;;  %v1181_v3 = vpack.c.bf16 %v1126_v59, %v4181_v17 }
 0x137   :  { %v955_v21 = vmul.f32 1.6732632, %v2718_v52  ;;  %v942_v46 = vmul.f32 1.6732632, %v2705_v1  ;;  %v783_v29 = vmul.f32 1.442695, %v690_v41  ;;  %v4286_v32 = vadd.f32 %v3839_v42, %v3930_v4 }
 0x138   :  { %v2716_v33 = vadd.f32 -1.0, %v3292_v26  ;;  %3303 = vpow2.f32 %v809_v0  ;;  %v805_v61 = vmul.f32 1.442695, %v701_v43  ;;  %v704_v18 = vmin.f32 %v4268_v45, 0.0  ;;  %3040 = vmatprep.mubr.bf16.mxu1 %v1181_v3  ;;  %v3296_v22 = vpop.eup %3295 }
 0x139   :  { %v4289_v25 = vmul.f32 1.050701, %v1078_v9  ;;  %v2719_v20 = vadd.f32 -1.0, %v3294_v28  ;;  %vm1020_vm3 = vcmp.gt.f32.partialorder %v4175_v16, 0.0  ;;  %vm1018_vm4 = vcmp.gt.f32.partialorder %v4179_v58, 0.0 }
 0x13a   :  { %v4293_v17 = vmul.f32 1.050701, %v1071_v50  ;;  %v4295_v59 = vmul.f32 1.050701, %v1069_v56  ;;  %v811_v4 = vmul.f32 1.442695, %v704_v18  ;;  %v1072_v39 = vsel %vm1008_vm0, %v4110_v14, %v944_v57 }
 0x13b   :  { %v3298_v19 = vpop.eup %3297  ;;  %v1083_v13 = vsel %vm1019_vm15, %v4092_v62, %v955_v21  ;;  %3305 = vpow2.f32 %v783_v29  ;;  %v702_v8 = vmin.f32 %v4286_v32, 0.0  ;;  %v1070_v52 = vsel %vm1006_vm1, %v4134_v6, %v942_v46 }
 0x13c   :  { %v3300_v24 = vpop.eup %3299  ;;  %v953_v1 = vmul.f32 1.6732632, %v2716_v33  ;;  %v2717_v15 = vadd.f32 -1.0, %v3296_v22  ;;  %3307 = vpow2.f32 %v805_v61  ;;  %v956_v41 = vmul.f32 1.6732632, %v2719_v20 }
 0x13d   :  { %3309 = vpow2.f32 %v811_v4  ;;  %v807_v26 = vmul.f32 1.442695, %v702_v8  ;;  %v1182_v14 = vpack.c.bf16 %v4186_v2, %v4157_v36  ;;  %v3302_v9 = vpop.eup %3301  ;;  %v2710_v50 = vadd.f32 -1.0, %v3298_v19 }
 0x13e   :  { %vm1011_vm5 = vcmp.gt.f32.partialorder %v4202_v54, 0.0  ;;  %vm1009_vm6 = vcmp.gt.f32.partialorder %v4216_v63, 0.0  ;;  %v4313_v62 = vadd.f32 %v3946_v31, %v3839_v42  ;;  %v4317_v6 = vadd.f32 %v3839_v42, %v3948_v35 }
 0x13f   :  { %v4321_v43 = vadd.f32 %v3956_v40, %v3839_v42  ;;  %v4323_v28 = vmul.f32 1.050701, %v1072_v39  ;;  %v4325_v36 = vmul.f32 1.050701, %v1083_v13  ;;  %v2708_v2 = vadd.f32 -1.0, %v3300_v24  ;;  %3041 = vmatmul.mubr.bf16.gmra.mrb[48].mxu1 %v1182_v14 }
 0x140   :  { %3311 = vpow2.f32 %v807_v26  ;;  %v4327_v56 = vmul.f32 1.050701, %v1070_v52  ;;  %v954_v57 = vmul.f32 1.6732632, %v2717_v15  ;;  %vm1012_vm7 = vcmp.gt.f32.partialorder %v4221_v7, 0.0 }
 0x141   :  { %v707_v31 = vmin.f32 %v4313_v62, 0.0  ;;  %v705_v35 = vmin.f32 %v4317_v6, 0.0  ;;  %v1081_v40 = vsel %vm1017_vm2, %v4167_v37, %v953_v1  ;;  %v1084_v0 = vsel %vm1020_vm3, %v4175_v16, %v956_v41 }
 0x142   :  { %v2711_v3 = vadd.f32 -1.0, %v3302_v9  ;;  %v708_v21 = vmin.f32 %v4321_v43, 0.0  ;;  %v3304_v46 = vpop.eup %3303  ;;  %v947_v29 = vmul.f32 1.6732632, %v2710_v50  ;;  %vm1023_vm8 = vcmp.gt.f32.partialorder %v4251_v27, 0.0 }
 0x143   :  { %v817_v33 = vmul.f32 1.442695, %v707_v31  ;;  %v813_v61 = vmul.f32 1.442695, %v705_v35  ;;  %v4342_v18 = vadd.f32 %v3839_v42, %v3960_v44  ;;  %v945_v22 = vmul.f32 1.6732632, %v2708_v2 }
 0x144   :  { %v819_v20 = vmul.f32 1.442695, %v708_v21  ;;  %v1183_v37 = vpack.c.bf16 %v4257_v34, %v4235_v49  ;;  %v1184_v16 = vpack.c.bf16 %v4239_v38, %v4233_v48  ;;  %v4348_v4 = vmul.f32 1.050701, %v1081_v40  ;;  %v4357_v49 = vld [vmem:[%s5156_s2] ss:$0 sm:$0xff] }
 0x145   :  { %v1082_v19 = vsel %vm1018_vm4, %v4179_v58, %v954_v57  ;;  %3313 = vpow2.f32 %v817_v33  ;;  %v706_v39 = vmin.f32 %v4342_v18, 0.0  ;;  %v3306_v13 = vpop.eup %3305  ;;  %v948_v42 = vmul.f32 1.6732632, %v2711_v3 }
 0x146   :  { %v2722_v44 = vadd.f32 -1.0, %v3304_v46  ;;  %3315 = vpow2.f32 %v813_v61  ;;  %3044 = vmatprep.mubr.bf16.mxu1 %v1183_v37  ;;  %v4361_v48 = vadd.f32 %v4357_v49, %v3985_v5  ;;  %v3308_v38 = vpop.eup %3307  ;;  %v4363_v34 = vmul.f32 1.050701, %v1084_v0 }
 0x147   :  { %vm1021_vm9 = vcmp.gt.f32.partialorder %v4262_v51, 0.0  ;;  %3317 = vpow2.f32 %v819_v20  ;;  %v815_v58 = vmul.f32 1.442695, %v706_v39  ;;  %v4368_v8 = vadd.f32 %v4357_v49, %v3997_v30  ;;  %v3310_v24 = vpop.eup %3309  ;;  %3045 = vmatmul.mubr.bf16.gmra.mrb[52].mxu1 %v1184_v16  ;;  %v5174_v20 = vld [vmem:[#allocation5_spill] sm:$0xff] }
 0x148   :  { %v1075_v52 = vsel %vm1011_vm5, %v4202_v54, %v947_v29  ;;  %v1073_v5 = vsel %vm1009_vm6, %v4216_v63, %v945_v22  ;;  %vm1010_vm10 = vcmp.gt.f32.partialorder %v4255_v11, 0.0  ;;  %vm1024_vm11 = vcmp.gt.f32.partialorder %v4268_v45, 0.0 }
 0x149   :  { %v711_v1 = vmin.f32 %v4361_v48, 0.0  ;;  %v4379_v15 = vmul.f32 1.050701, %v1082_v19  ;;  %v2709_v30 = vadd.f32 -1.0, %v3306_v13  ;;  %vm1022_vm12 = vcmp.gt.f32.partialorder %v4286_v32, 0.0  ;;  %v5175_v19 = vld [vmem:[#allocation6_spill] sm:$0xff] }
 0x14a   :  { %3319 = vpow2.f32 %v815_v58  ;;  %v3312_v41 = vpop.eup %3311  ;;  %v1076_v54 = vsel %vm1012_vm7, %v4221_v7, %v948_v42  ;;  %v959_v26 = vmul.f32 1.6732632, %v2722_v44  ;;  %v2720_v63 = vadd.f32 -1.0, %v3308_v38 }
 0x14b   :  { %v825_v14 = vmul.f32 1.442695, %v711_v1  ;;  %v4385_v9 = vmul.f32 1.050701, %v1075_v52  ;;  %v4387_v50 = vmul.f32 1.050701, %v1073_v5  ;;  %v4393_v35 = vadd.f32 %v4357_v49, %v4004_v47 }
 0x14c   :  { %v2723_v2 = vadd.f32 -1.0, %v3310_v24  ;;  %v709_v57 = vmin.f32 %v4368_v8, 0.0  ;;  %v2721_v31 = vadd.f32 -1.0, %v3312_v41  ;;  %vm1027_vm13 = vcmp.gt.f32.partialorder %v4313_v62, 0.0 }
 0x14d   :  { %3321 = vpow2.f32 %v825_v14  ;;  %v4397_v7 = vadd.f32 %v4357_v49, %v4009_v53  ;;  %v4399_v40 = vmul.f32 1.050701, %v1076_v54  ;;  %v946_v0 = vmul.f32 1.6732632, %v2709_v30  ;;  %v5176_v14 = vld [vmem:[#allocation7_spill] sm:$0xff] }
 0x14e   :  { %vm1025_vm14 = vcmp.gt.f32.partialorder %v4317_v6, 0.0  ;;  %v821_v3 = vmul.f32 1.442695, %v709_v57  ;;  %v1185_v21 = vpack.c.bf16 %v4327_v56, %v4295_v59  ;;  %v1087_v46 = vsel %vm1023_vm8, %v4251_v27, %v959_v26 }
 0x14f   :  { %v957_v29 = vmul.f32 1.6732632, %v2720_v63  ;;  %vm1028_vm15 = vcmp.gt.f32.partialorder %v4321_v43, 0.0  ;;  %v712_v47 = vmin.f32 %v4393_v35, 0.0  ;;  %v710_v53 = vmin.f32 %v4397_v7, 0.0  ;;  %v3314_v33 = vpop.eup %3313 }
 0x150   :  { %v960_v61 = vmul.f32 1.6732632, %v2723_v2  ;;  %3323 = vpow2.f32 %v821_v3  ;;  %3048 = vmatprep.mubr.bf16.mxu1 %v1185_v21  ;;  %v1186_v22 = vpack.c.bf16 %v4323_v28, %v4293_v17  ;;  %v4414_v59 = vadd.f32 %v4357_v49, %v5174_v20  ;;  %v3316_v56 = vpop.eup %3315 }
 0x151   :  { %v958_v27 = vmul.f32 1.6732632, %v2721_v31  ;;  %v2726_v37 = vadd.f32 -1.0, %v3314_v33  ;;  %v827_v16 = vmul.f32 1.442695, %v712_v47  ;;  %v4418_v39 = vadd.f32 %v4357_v49, %v5175_v19  ;;  %v3318_v13 = vpop.eup %3317 }
 0x152   :  { %v1074_v42 = vsel %vm1010_vm10, %v4255_v11, %v946_v0  ;;  %v2724_v44 = vadd.f32 -1.0, %v3316_v56  ;;  %v823_v38 = vmul.f32 1.442695, %v710_v53  ;;  %3049 = vmatmul.mubr.bf16.gmra.mrb[56].mxu1 %v1186_v22  ;;  %v715_v17 = vmin.f32 %v4414_v59, 0.0 }
 0x153   :  { %v1085_v28 = vsel %vm1021_vm9, %v4262_v51, %v957_v29  ;;  %v2727_v58 = vadd.f32 -1.0, %v3318_v13  ;;  %3325 = vpow2.f32 %v827_v16  ;;  %v713_v24 = vmin.f32 %v4418_v39, 0.0  ;;  %v5177_v29 = vld [vmem:[#allocation8_spill] sm:$0xff] }
 0x154   :  { %v3320_v52 = vpop.eup %3319  ;;  %v1088_v5 = vsel %vm1024_vm11, %v4268_v45, %v960_v61  ;;  %v963_v1 = vmul.f32 1.6732632, %v2726_v37  ;;  %vm1026_vm0 = vcmp.gt.f32.partialorder %v4342_v18, 0.0  ;;  %3327 = vpow2.f32 %v823_v38 }
 0x155   :  { %v833_v11 = vmul.f32 1.442695, %v715_v17  ;;  %v1138_v30 = vmul.f32 1.050701, %v1074_v42  ;;  %v1086_v41 = vsel %vm1022_vm12, %v4286_v32, %v958_v27  ;;  %v961_v51 = vmul.f32 1.6732632, %v2724_v44 }
 0x156   :  { %v829_v54 = vmul.f32 1.442695, %v713_v24  ;;  %v4435_v26 = vmul.f32 1.050701, %v1087_v46  ;;  %v964_v63 = vmul.f32 1.6732632, %v2727_v58  ;;  %v4439_v2 = vadd.f32 %v4357_v49, %v5176_v14 }
 0x157   :  { %3329 = vpow2.f32 %v833_v11  ;;  %v3322_v45 = vpop.eup %3321  ;;  %v4441_v57 = vmul.f32 1.050701, %v1085_v28  ;;  %v4443_v31 = vmul.f32 1.050701, %v1088_v5  ;;  %v2725_v0 = vadd.f32 -1.0, %v3320_v52  ;;  %v5178_v52 = vld [vmem:[#allocation9_spill] sm:$0xff] }
 0x158   :  { %vm1031_vm1 = vcmp.gt.f32.partialorder %v4361_v48, 0.0  ;;  %3331 = vpow2.f32 %v829_v54  ;;  %v4446_v32 = vmul.f32 1.050701, %v1086_v41  ;;  %v1091_v3 = vsel %vm1027_vm13, %v4313_v62, %v963_v1  ;;  %v5179_v1 = vld [vmem:[#allocation14_spill] sm:$0xff] }
 0x159   :  { %vm1029_vm2 = vcmp.gt.f32.partialorder %v4368_v8, 0.0  ;;  %vm1032_vm3 = vcmp.gt.f32.partialorder %v4393_v35, 0.0  ;;  %v716_v21 = vmin.f32 %v4439_v2, 0.0  ;;  %v1089_v46 = vsel %vm1025_vm14, %v4317_v6, %v961_v51 }
 0x15a   :  { %v4459_v47 = vadd.f32 %v4357_v49, %v5177_v29  ;;  %v1187_v53 = vpack.c.bf16 %v1138_v30, %v4387_v50  ;;  %v1188_v33 = vpack.c.bf16 %v4399_v40, %v4385_v9  ;;  %v3324_v62 = vpop.eup %3323  ;;  %v1092_v61 = vsel %vm1028_vm15, %v4321_v43, %v964_v63 }
 0x15b   :  { %v2730_v22 = vadd.f32 -1.0, %v3322_v45  ;;  %vm1030_vm4 = vcmp.gt.f32.partialorder %v4397_v7, 0.0  ;;  %v835_v20 = vmul.f32 1.442695, %v716_v21  ;;  %v1189_v6 = vpack.c.bf16 %v4289_v25, %v4237_v55 }
 0x15c   :  { %v962_v56 = vmul.f32 1.6732632, %v2725_v0  ;;  %v2728_v27 = vadd.f32 -1.0, %v3324_v62  ;;  %v714_v37 = vmin.f32 %v4459_v47, 0.0  ;;  %3052 = vmatprep.mubr.bf16.mxu1 %v1187_v53  ;;  %v4473_v9 = vadd.f32 %v4357_v49, %v4060_v23 }
 0x15d   :  { %v4475_v50 = vmul.f32 1.050701, %v1091_v3  ;;  %vm1035_vm5 = vcmp.gt.f32.partialorder %v4414_v59, 0.0  ;;  %3333 = vpow2.f32 %v835_v20  ;;  %3053 = vmatmul.mubr.bf16.gmra.mrb[60].mxu1 %v1188_v33  ;;  %v4480_v43 = vadd.f32 %v4357_v49, %v4076_v10  ;;  %v3326_v55 = vpop.eup %3325  ;;  %v5180_v33 = vld [vmem:[#allocation10_spill] sm:$0xff] }
 0x15e   :  { %v4482_v25 = vmul.f32 1.050701, %v1089_v46  ;;  %v4484_v40 = vmul.f32 1.050701, %v1092_v61  ;;  %vm1033_vm6 = vcmp.gt.f32.partialorder %v4418_v39, 0.0  ;;  %3056 = vmatprep.mubr.bf16.mxu1 %v1189_v6  ;;  %v4489_v23 = vadd.f32 %v4357_v49, %v4082_v60  ;;  %v3328_v19 = vpop.eup %3327 }
 0x15f   :  { %v831_v16 = vmul.f32 1.442695, %v714_v37  ;;  %v967_v13 = vmul.f32 1.6732632, %v2730_v22  ;;  %v2731_v42 = vadd.f32 -1.0, %v3326_v55  ;;  %v719_v44 = vmin.f32 %v4473_v9, 0.0 }
 0x160   :  { %v717_v10 = vmin.f32 %v4480_v43, 0.0  ;;  %v1090_v38 = vsel %vm1026_vm0, %v4342_v18, %v962_v56  ;;  %v965_v17 = vmul.f32 1.6732632, %v2728_v27  ;;  %v2729_v28 = vadd.f32 -1.0, %v3328_v19 }
 0x161   :  { %3335 = vpow2.f32 %v831_v16  ;;  %v3330_v58 = vpop.eup %3329  ;;  %v968_v24 = vmul.f32 1.6732632, %v2731_v42  ;;  %vm1036_vm7 = vcmp.gt.f32.partialorder %v4439_v2, 0.0  ;;  %v841_v60 = vmul.f32 1.442695, %v719_v44  ;;  %v5182_v16 = vld [vmem:[#allocation12_spill] sm:$0xff] }
 0x162   :  { %v4499_v5 = vadd.f32 %v4357_v49, %v5178_v52  ;;  %v1190_v11 = vpack.c.bf16 %v4270_v12, %v5179_v1  ;;  %v3332_v30 = vpop.eup %3331  ;;  %v966_v41 = vmul.f32 1.6732632, %v2729_v28  ;;  %v2734_v51 = vadd.f32 -1.0, %v3330_v58  ;;  %v5183_v44 = vld [vmem:[#allocation13_spill] sm:$0xff] }
 0x163   :  { %v837_v54 = vmul.f32 1.442695, %v717_v10  ;;  %v720_v18 = vmin.f32 %v4489_v23, 0.0  ;;  %v4504_v63 = vmul.f32 1.050701, %v1090_v38  ;;  %v1095_v14 = vsel %vm1031_vm1, %v4361_v48, %v967_v13 }
 0x164   :  { %v2732_v45 = vadd.f32 -1.0, %v3332_v30  ;;  %3337 = vpow2.f32 %v841_v60  ;;  %v1093_v0 = vsel %vm1029_vm2, %v4368_v8, %v965_v17  ;;  %v1096_v12 = vsel %vm1032_vm3, %v4393_v35, %v968_v24 }
 0x165   :  { %v971_v3 = vmul.f32 1.6732632, %v2734_v51  ;;  %3339 = vpow2.f32 %v837_v54  ;;  %vm1034_vm8 = vcmp.gt.f32.partialorder %v4459_v47, 0.0  ;;  %v843_v46 = vmul.f32 1.442695, %v720_v18  ;;  %3057 = vmatmul.mubr.bf16.gmra.mrb[64].mxu1 %v1190_v11 }
 0x166   :  { %v969_v21 = vmul.f32 1.6732632, %v2732_v45  ;;  %v1191_v48 = vpack.c.bf16 %v4379_v15, %v4348_v4  ;;  %v4518_v29 = vmul.f32 1.050701, %v1095_v14  ;;  %v1094_v8 = vsel %vm1030_vm4, %v4397_v7, %v966_v41  ;;  %v5181_v4 = vld [vmem:[#allocation11_spill] sm:$0xff] }
 0x167   :  { %v718_v53 = vmin.f32 %v4499_v5, 0.0  ;;  %v4526_v35 = vadd.f32 %v4357_v49, %v5180_v33  ;;  %v3334_v62 = vpop.eup %3333  ;;  %v4528_v61 = vmul.f32 1.050701, %v1093_v0  ;;  %v4530_v22 = vmul.f32 1.050701, %v1096_v12 }
 0x168   :  { %vm1039_vm9 = vcmp.gt.f32.partialorder %v4473_v9, 0.0  ;;  %3341 = vpow2.f32 %v843_v46  ;;  %3060 = vmatprep.mubr.bf16.mxu1 %v1191_v48  ;;  %v4535_v15 = vadd.f32 %v4357_v49, %v5181_v4  ;;  %v1099_v7 = vsel %vm1035_vm5, %v4414_v59, %v971_v3 }
 0x169   :  { %v2735_v20 = vadd.f32 -1.0, %v3334_v62  ;;  %v839_v6 = vmul.f32 1.442695, %v718_v53  ;;  %v723_v56 = vmin.f32 %v4526_v35, 0.0  ;;  %v4541_v27 = vmul.f32 1.050701, %v1094_v8 }
 0x16a   :  { %v1097_v37 = vsel %vm1033_vm6, %v4418_v39, %v969_v21  ;;  %v721_v55 = vmin.f32 %v4535_v15, 0.0  ;;  %v4549_v19 = vadd.f32 %v4357_v49, %v5182_v16  ;;  %vm1037_vm10 = vcmp.gt.f32.partialorder %v4480_v43, 0.0 }
 0x16b   :  { %v3336_v13 = vpop.eup %3335  ;;  %v972_v42 = vmul.f32 1.6732632, %v2735_v20  ;;  %3343 = vpow2.f32 %v839_v6  ;;  %v849_v59 = vmul.f32 1.442695, %v723_v56  ;;  %v4554_v10 = vadd.f32 %v4357_v49, %v5183_v44 }
 0x16c   :  { %v4556_v38 = vmul.f32 1.050701, %v1099_v7  ;;  %v2733_v17 = vadd.f32 -1.0, %v3336_v13  ;;  %v845_v39 = vmul.f32 1.442695, %v721_v55  ;;  %v724_v28 = vmin.f32 %v4549_v19, 0.0 }
 0x16d   :  { %v4559_v58 = vmul.f32 1.050701, %v1097_v37  ;;  %v1100_v24 = vsel %vm1036_vm7, %v4439_v2, %v972_v42  ;;  %3345 = vpow2.f32 %v849_v59  ;;  %v722_v60 = vmin.f32 %v4554_v10, 0.0 }
 0x16e   :  { %v3338_v52 = vpop.eup %3337  ;;  %v4565_v1 = vmul.f32 1.050701, %v1100_v24  ;;  %v970_v49 = vmul.f32 1.6732632, %v2733_v17  ;;  %3347 = vpow2.f32 %v845_v39  ;;  %v851_v11 = vmul.f32 1.442695, %v724_v28 }
 0x16f   :  { %v3340_v30 = vpop.eup %3339  ;;  %v2738_v41 = vadd.f32 -1.0, %v3338_v52  ;;  %v847_v51 = vmul.f32 1.442695, %v722_v60  ;;  %v1192_v54 = vpack.c.bf16 %v4363_v34, %v4325_v36  ;;  %v1193_v18 = vpack.c.bf16 %v4446_v32, %v4441_v57 }
 0x170   :  { %v1098_v2 = vsel %vm1034_vm8, %v4459_v47, %v970_v49  ;;  %v2736_v14 = vadd.f32 -1.0, %v3340_v30  ;;  %3349 = vpow2.f32 %v851_v11  ;;  %v1194_v45 = vpack.c.bf16 %v4443_v31, %v4435_v26  ;;  %v3222_v31 = vld [vmem:[%s5159_s5 + $0x28] sm:$0xff]  }
 0x171   :  { %v4576_v0 = vmul.f32 1.050701, %v1098_v2  ;;  %v975_v12 = vmul.f32 1.6732632, %v2738_v41  ;;  %3351 = vpow2.f32 %v847_v51  ;;  %3061 = vmatmul.mubr.bf16.gmra.mrb[68].mxu1 %v1192_v54  ;;  %v1195_v36 = vpack.c.bf16 %v4504_v63, %v4482_v25  ;;  %3098 = vmatprep.subr.bf16.mxu0 %v3222_v31 }
 0x172   :  { %v3342_v34 = vpop.eup %3341  ;;  %v973_v3 = vmul.f32 1.6732632, %v2736_v14  ;;  %3064 = vmatprep.mubr.bf16.mxu1 %v1193_v18  ;;  %v1196_v57 = vpack.c.bf16 %v4484_v40, %v4475_v50  ;;  %v1197_v32 = vpack.c.bf16 %v4541_v27, %v4528_v61  ;;  %v1198_v26 = vpack.c.bf16 %v4530_v22, %v4518_v29  ;;  %3099 = vmatpush3.bf16.msra.mxu0 %v3222_v31 }
 0x173   :  { %v1103_v47 = vsel %vm1039_vm9, %v4473_v9, %v975_v12  ;;  %v2739_v25 = vadd.f32 -1.0, %v3342_v34  ;;  %v1199_v63 = vpack.c.bf16 %v4576_v0, %v4559_v58  ;;  %v1200_v50 = vpack.c.bf16 %v4565_v1, %v4556_v38 }
 0x174   :  { %vm1040_vm11 = vcmp.gt.f32.partialorder %v4489_v23, 0.0  ;;  %v1167_v46 = vmul.f32 1.050701, %v1103_v47  ;;  %v1101_v48 = vsel %vm1037_vm10, %v4480_v43, %v973_v3  ;;  %vm1038_vm12 = vcmp.gt.f32.partialorder %v4499_v5, 0.0 }
 0x175   :  { %v3344_v40 = vpop.eup %3343  ;;  %v976_v21 = vmul.f32 1.6732632, %v2739_v25  ;;  %v1165_v22 = vmul.f32 1.050701, %v1101_v48  ;;  %vm1043_vm13 = vcmp.gt.f32.partialorder %v4526_v35, 0.0  ;;  %vm1041_vm14 = vcmp.gt.f32.partialorder %v4535_v15, 0.0 }
 0x176   :  { %v2737_v29 = vadd.f32 -1.0, %v3344_v40  ;;  %vm1044_vm15 = vcmp.gt.f32.partialorder %v4549_v19, 0.0  ;;  %vm1042_vm0 = vcmp.gt.f32.partialorder %v4554_v10, 0.0 }
 0x177   :  { %v3346_v9 = vpop.eup %3345  ;;  %v1104_v8 = vsel %vm1040_vm11, %v4489_v23, %v976_v21  ;;  %v3223_v23 = vld [vmem:[%s5159_s5 + $0x30] sm:$0xff]  }
 0x178   :  { %v3348_v53 = vpop.eup %3347  ;;  %v1168_v33 = vmul.f32 1.050701, %v1104_v8  ;;  %v974_v62 = vmul.f32 1.6732632, %v2737_v29  ;;  %v2742_v61 = vadd.f32 -1.0, %v3346_v9  ;;  %3100 = vmatprep.subr.bf16.mxu0 %v3223_v23 }
 0x179   :  { %v2740_v4 = vadd.f32 -1.0, %v3348_v53  ;;  %3065 = vmatmul.mubr.bf16.gmra.mrb[72].mxu1 %v1194_v45  ;;  %3101 = vmatpush3.bf16.msra.mxu0 %v3223_v23 }
 0x17a   :  { %v3350_v7 = vpop.eup %3349  ;;  %v1102_v20 = vsel %vm1038_vm12, %v4499_v5, %v974_v62  ;;  %v979_v6 = vmul.f32 1.6732632, %v2742_v61  ;;  %3068 = vmatprep.mubr.bf16.mxu1 %v1195_v36  ;;  %v1202_v43 = vpack.c.bf16 %v1168_v33, %v1167_v46 }
 0x17b   :  { %v3352_v56 = vpop.eup %3351  ;;  %v1166_v27 = vmul.f32 1.050701, %v1102_v20  ;;  %v977_v37 = vmul.f32 1.6732632, %v2740_v4  ;;  %v2743_v55 = vadd.f32 -1.0, %v3350_v7 }
 0x17c   :  { %v1107_v16 = vsel %vm1043_vm13, %v4526_v35, %v979_v6  ;;  %v2741_v13 = vadd.f32 -1.0, %v3352_v56 }
 0x17d   :  { %v1105_v5 = vsel %vm1041_vm14, %v4535_v15, %v977_v37  ;;  %v980_v42 = vmul.f32 1.6732632, %v2743_v55  ;;  %v1201_v59 = vpack.c.bf16 %v1166_v27, %v1165_v22  ;;  %v1171_v44 = vmul.f32 1.050701, %v1107_v16  ;;  %v3224_v15 = vld [vmem:[%s5159_s5 + $0x38] sm:$0xff]  }
 0x17e   :  { %v978_v38 = vmul.f32 1.6732632, %v2741_v13  ;;  %v1169_v17 = vmul.f32 1.050701, %v1105_v5  ;;  %3102 = vmatprep.subr.bf16.mxu0 %v3224_v15 }
 0x17f   :  { %v1108_v39 = vsel %vm1044_vm15, %v4549_v19, %v980_v42  ;;  %3103 = vmatpush3.bf16.msra.mxu0 %v3224_v15  ;;  %v4620_v19 = vld [vmem:[%s5158_s4] ss:$0 sm:$0xff] }
 0x180   :  { %v1172_v28 = vmul.f32 1.050701, %v1108_v39  ;;  %v1106_v58 = vsel %vm1042_vm0, %v4554_v10, %v978_v38 }
 0x181   :  { %v1170_v35 = vmul.f32 1.050701, %v1106_v58  ;;  %3069 = vmatmul.mubr.bf16.gmra.mrb[76].mxu1 %v1196_v57 }
 0x182   :  { %3072 = vmatprep.mubr.bf16.mxu1 %v1197_v32  ;;  %v1204_v24 = vpack.c.bf16 %v1172_v28, %v1171_v44 }
 0x183   :  { %v1203_v60 = vpack.c.bf16 %v1170_v35, %v1169_v17 }
 0x189   :  { %3073 = vmatmul.mubr.bf16.gmra.mrb[80].mxu1 %v1198_v26 }
 0x18a   :  { %3076 = vmatprep.mubr.bf16.mxu1 %v1199_v63 }
 0x191   :  { %3077 = vmatmul.mubr.bf16.gmra.mrb[84].mxu1 %v1200_v50 }
 0x192   :  { %3080 = vmatprep.mubr.bf16.mxu1 %v1201_v59 }
 0x199   :  { %3081 = vmatmul.mubr.bf16.gmra.mrb[88].mxu1 %v1202_v43 }
 0x19a   :  { %3084 = vmatprep.mubr.bf16.mxu1 %v1203_v60 }
 0x1a1   :  { %3085 = vmatmul.mubr.bf16.gmra.mrb[92].mxu1 %v1204_v24 }
 0x1d2   :  { %v3026_v10 = vpop.f32.mrb[32].mxu1 }
 0x1d3   :  { %v1319_v52 = vadd.f32 %v3026_v10, %v4620_v19  ;;  %v1310_v1 = vpop.f32.mrb[33].mxu1 }
 0x1d4   :  { %v4624_v49 = vadd.f32 %v4620_v19, %v1310_v1  ;;  %v3027_v11 = vpop.f32.mrb[34].mxu1 }
 0x1d5   :  { %v1567_v30 = vmin.f32 %v1319_v52, 0.0  ;;  %v1322_v41 = vadd.f32 %v3027_v11, %v4620_v19  ;;  %v1313_v51 = vpop.f32.mrb[35].mxu1  ;;  %vm1887_vm1 = vcmp.gt.f32.partialorder %v1319_v52, 0.0 }
 0x1d6   :  { %v1565_v54 = vmin.f32 %v4624_v49, 0.0  ;;  %v1314_v18 = vadd.f32 %v4620_v19, %v1313_v51  ;;  %vm1885_vm4 = vcmp.gt.f32.partialorder %v4624_v49, 0.0 }
 0x1d7   :  { %v1633_v2 = vmul.f32 1.442695, %v1567_v30  ;;  %v1568_v14 = vmin.f32 %v1322_v41, 0.0  ;;  %vm1888_vm2 = vcmp.gt.f32.partialorder %v1322_v41, 0.0 }
 0x1d8   :  { %v1629_v45 = vmul.f32 1.442695, %v1565_v54  ;;  %v1566_v0 = vmin.f32 %v1314_v18, 0.0  ;;  %vm1886_vm3 = vcmp.gt.f32.partialorder %v1314_v18, 0.0 }
 0x1d9   :  { %3353 = vpow2.f32 %v1633_v2  ;;  %v1635_v12 = vmul.f32 1.442695, %v1568_v14 }
 0x1da   :  { %3355 = vpow2.f32 %v1629_v45  ;;  %v1631_v36 = vmul.f32 1.442695, %v1566_v0  ;;  %v3030_v34 = vpop.f32.mrb[36].mxu1 }
 0x1db   :  { %3357 = vpow2.f32 %v1635_v12  ;;  %v4630_v3 = vadd.f32 %v3030_v34, %v4620_v19  ;;  %v1326_v57 = vpop.f32.mrb[37].mxu1 }
 0x1dc   :  { %3359 = vpow2.f32 %v1631_v36  ;;  %v4633_v32 = vadd.f32 %v4620_v19, %v1326_v57  ;;  %v3031_v26 = vpop.f32.mrb[38].mxu1 }
 0x1dd   :  { %v1571_v31 = vmin.f32 %v4630_v3, 0.0  ;;  %v4637_v47 = vadd.f32 %v3031_v26, %v4620_v19  ;;  %v1329_v25 = vpop.f32.mrb[39].mxu1  ;;  %vm1891_vm5 = vcmp.gt.f32.partialorder %v4630_v3, 0.0 }
 0x1de   :  { %v1569_v63 = vmin.f32 %v4633_v32, 0.0  ;;  %v4641_v50 = vadd.f32 %v4620_v19, %v1329_v25  ;;  %vm1889_vm6 = vcmp.gt.f32.partialorder %v4633_v32, 0.0 }
 0x1df   :  { %v1641_v40 = vmul.f32 1.442695, %v1571_v31  ;;  %v1572_v21 = vmin.f32 %v4637_v47, 0.0  ;;  %vm1892_vm7 = vcmp.gt.f32.partialorder %v4637_v47, 0.0 }
 0x1e0   :  { %v1637_v46 = vmul.f32 1.442695, %v1569_v63  ;;  %v1570_v48 = vmin.f32 %v4641_v50, 0.0  ;;  %vm1890_vm8 = vcmp.gt.f32.partialorder %v4641_v50, 0.0 }
 0x1e1   :  { %3361 = vpow2.f32 %v1641_v40  ;;  %v1643_v29 = vmul.f32 1.442695, %v1572_v21 }
 0x1e2   :  { %3363 = vpow2.f32 %v1637_v46  ;;  %v1639_v8 = vmul.f32 1.442695, %v1570_v48 }
 0x1e3   :  { %v3354_v9 = vpop.eup %3353  ;;  %3365 = vpow2.f32 %v1643_v29 }
 0x1e4   :  { %v3356_v53 = vpop.eup %3355  ;;  %v2755_v33 = vadd.f32 -1.0, %v3354_v9  ;;  %3367 = vpow2.f32 %v1639_v8 }
 0x1e5   :  { %v3358_v62 = vpop.eup %3357  ;;  %v2753_v61 = vadd.f32 -1.0, %v3356_v53 }
 0x1e6   :  { %v3360_v22 = vpop.eup %3359  ;;  %v1823_v4 = vmul.f32 1.6732632, %v2755_v33  ;;  %v2756_v7 = vadd.f32 -1.0, %v3358_v62 }
 0x1e7   :  { %v2754_v20 = vadd.f32 -1.0, %v3360_v22  ;;  %v1821_v23 = vmul.f32 1.6732632, %v2753_v61 }
 0x1e8   :  { %v1951_v6 = vsel %vm1887_vm1, %v1319_v52, %v1823_v4  ;;  %v1824_v43 = vmul.f32 1.6732632, %v2756_v7  ;;  %v3034_v37 = vpop.f32.mrb[40].mxu1 }
 0x1e9   :  { %v1822_v56 = vmul.f32 1.6732632, %v2754_v20  ;;  %v2015_v55 = vmul.f32 1.050701, %v1951_v6  ;;  %v4646_v5 = vadd.f32 %v3034_v37, %v4620_v19  ;;  %v1342_v42 = vpop.f32.mrb[41].mxu1  ;;  %v1949_v39 = vsel %vm1885_vm4, %v4624_v49, %v1821_v23 }
 0x1ea   :  { %v1952_v27 = vsel %vm1888_vm2, %v1322_v41, %v1824_v43  ;;  %v4652_v44 = vadd.f32 %v4620_v19, %v1342_v42  ;;  %v3035_v38 = vpop.f32.mrb[42].mxu1  ;;  %v2013_v12 = vmul.f32 1.050701, %v1949_v39 }
 0x1eb   :  { %v2016_v16 = vmul.f32 1.050701, %v1952_v27  ;;  %v1950_v13 = vsel %vm1886_vm3, %v1314_v18, %v1822_v56  ;;  %v3362_v59 = vpop.eup %3361  ;;  %v1575_v35 = vmin.f32 %v4646_v5, 0.0  ;;  %v1345_v24 = vpop.f32.mrb[43].mxu1  ;;  %v4658_v1 = vadd.f32 %v3035_v38, %v4620_v19 }
 0x1ec   :  { %v3364_v17 = vpop.eup %3363  ;;  %v2759_v58 = vadd.f32 -1.0, %v3362_v59  ;;  %v2014_v15 = vmul.f32 1.050701, %v1950_v13  ;;  %v1573_v52 = vmin.f32 %v4652_v44, 0.0  ;;  %v4661_v54 = vadd.f32 %v4620_v19, %v1345_v24 }
 0x1ed   :  { %v2078_v28 = vpack.c.bf16 %v2016_v16, %v2015_v55  ;;  %v3366_v60 = vpop.eup %3365  ;;  %v2757_v10 = vadd.f32 -1.0, %v3364_v17  ;;  %v1649_v51 = vmul.f32 1.442695, %v1575_v35  ;;  %v1576_v14 = vmin.f32 %v4658_v1, 0.0 }
 0x1ee   :  { %v3368_v11 = vpop.eup %3367  ;;  %v1827_v30 = vmul.f32 1.6732632, %v2759_v58  ;;  %v2760_v41 = vadd.f32 -1.0, %v3366_v60  ;;  %v1645_v2 = vmul.f32 1.442695, %v1573_v52  ;;  %v1574_v31 = vmin.f32 %v4661_v54, 0.0 }
 0x1ef   :  { %v1825_v49 = vmul.f32 1.6732632, %v2757_v10  ;;  %v2758_v18 = vadd.f32 -1.0, %v3368_v11  ;;  %3369 = vpow2.f32 %v1649_v51  ;;  %v1651_v26 = vmul.f32 1.442695, %v1576_v14 }
 0x1f0   :  { %v1955_v45 = vsel %vm1891_vm5, %v4630_v3, %v1827_v30  ;;  %v1828_v0 = vmul.f32 1.6732632, %v2760_v41  ;;  %3371 = vpow2.f32 %v1645_v2  ;;  %v2077_v40 = vpack.c.bf16 %v2014_v15, %v2013_v12 }
 0x1f1   :  { %v1953_v36 = vsel %vm1889_vm6, %v4633_v32, %v1825_v49  ;;  %v1826_v34 = vmul.f32 1.6732632, %v2758_v18  ;;  %v2019_v25 = vmul.f32 1.050701, %v1955_v45  ;;  %3373 = vpow2.f32 %v1651_v26 }
 0x1f2   :  { %v1956_v57 = vsel %vm1892_vm7, %v4637_v47, %v1828_v0  ;;  %v2017_v21 = vmul.f32 1.050701, %v1953_v36  ;;  %v1647_v48 = vmul.f32 1.442695, %v1574_v31  ;;  %3104 = vmatprep.mubr.bf16.mxu0 %v2077_v40  ;;  %vm1895_vm9 = vcmp.gt.f32.partialorder %v4646_v5, 0.0 }
 0x1f3   :  { %v2020_v3 = vmul.f32 1.050701, %v1956_v57  ;;  %v1954_v63 = vsel %vm1890_vm8, %v4641_v50, %v1826_v34  ;;  %3105 = vmatmul.mubr.bf16.vlgmr.msra.gmra.mrb[32].mxu0 %v2078_v28  ;;  %vm1893_vm10 = vcmp.gt.f32.partialorder %v4652_v44, 0.0  ;;  %vm1896_vm11 = vcmp.gt.f32.partialorder %v4658_v1, 0.0 }
 0x1f4   :  { %v2018_v46 = vmul.f32 1.050701, %v1954_v63  ;;  %3375 = vpow2.f32 %v1647_v48  ;;  %vm1894_vm12 = vcmp.gt.f32.partialorder %v4661_v54, 0.0 }
 0x1f5   :  { %v2080_v32 = vpack.c.bf16 %v2020_v3, %v2019_v25 }
 0x1f6   :  { %v2079_v29 = vpack.c.bf16 %v2018_v46, %v2017_v21 }
 0x1f8   :  { %3108 = vmatprep.mubr.bf16.mxu0 %v2079_v29 }
 0x1f9   :  { %v3370_v47 = vpop.eup %3369 }
 0x1fa   :  { %v3372_v9 = vpop.eup %3371  ;;  %v2763_v8 = vadd.f32 -1.0, %v3370_v47 }
 0x1fb   :  { %v2761_v53 = vadd.f32 -1.0, %v3372_v9  ;;  %v3374_v61 = vpop.eup %3373  ;;  %3109 = vmatmul.mubr.bf16.gmra.mrb[36].mxu0 %v2080_v32 }
 0x1fc   :  { %v1831_v33 = vmul.f32 1.6732632, %v2763_v8  ;;  %v2764_v7 = vadd.f32 -1.0, %v3374_v61 }
 0x1fd   :  { %v3038_v62 = vpop.f32.mrb[44].mxu1  ;;  %v1829_v4 = vmul.f32 1.6732632, %v2761_v53 }
 0x1fe   :  { %v1367_v50 = vadd.f32 %v3038_v62, %v4620_v19  ;;  %v1358_v22 = vpop.f32.mrb[45].mxu1  ;;  %v3376_v43 = vpop.eup %3375  ;;  %v1959_v27 = vsel %vm1895_vm9, %v4646_v5, %v1831_v33  ;;  %v1832_v37 = vmul.f32 1.6732632, %v2764_v7 }
 0x1ff   :  { %v4677_v20 = vadd.f32 %v4620_v19, %v1358_v22  ;;  %v3039_v6 = vpop.f32.mrb[46].mxu1  ;;  %v2762_v55 = vadd.f32 -1.0, %v3376_v43  ;;  %v1957_v38 = vsel %vm1893_vm10, %v4652_v44, %v1829_v4  ;;  %v2023_v58 = vmul.f32 1.050701, %v1959_v27 }
 0x200   :  { %v1579_v23 = vmin.f32 %v1367_v50, 0.0  ;;  %v1361_v56 = vpop.f32.mrb[47].mxu1  ;;  %v1370_v42 = vadd.f32 %v3039_v6, %v4620_v19  ;;  %v1960_v17 = vsel %vm1896_vm11, %v4658_v1, %v1832_v37  ;;  %v2021_v15 = vmul.f32 1.050701, %v1957_v38 }
 0x201   :  { %v1577_v16 = vmin.f32 %v4677_v20, 0.0  ;;  %v1362_v59 = vadd.f32 %v4620_v19, %v1361_v56  ;;  %v1830_v39 = vmul.f32 1.6732632, %v2762_v55  ;;  %v2024_v35 = vmul.f32 1.050701, %v1960_v17 }
 0x202   :  { %v1657_v13 = vmul.f32 1.442695, %v1579_v23  ;;  %v1580_v5 = vmin.f32 %v1370_v42, 0.0  ;;  %vm1899_vm13 = vcmp.gt.f32.partialorder %v1367_v50, 0.0  ;;  %vm1897_vm14 = vcmp.gt.f32.partialorder %v4677_v20, 0.0 }
 0x203   :  { %v1653_v28 = vmul.f32 1.442695, %v1577_v16  ;;  %v1958_v24 = vsel %vm1894_vm12, %v4661_v54, %v1830_v39  ;;  %v1578_v60 = vmin.f32 %v1362_v59, 0.0  ;;  %v2082_v11 = vpack.c.bf16 %v2024_v35, %v2023_v58 }
 0x204   :  { %3377 = vpow2.f32 %v1657_v13  ;;  %v2022_v10 = vmul.f32 1.050701, %v1958_v24  ;;  %v1659_v52 = vmul.f32 1.442695, %v1580_v5  ;;  %vm1900_vm15 = vcmp.gt.f32.partialorder %v1370_v42, 0.0 }
 0x205   :  { %3379 = vpow2.f32 %v1653_v28  ;;  %v1655_v30 = vmul.f32 1.442695, %v1578_v60  ;;  %vm1898_vm0 = vcmp.gt.f32.partialorder %v1362_v59, 0.0 }
 0x206   :  { %3381 = vpow2.f32 %v1659_v52  ;;  %v2081_v41 = vpack.c.bf16 %v2022_v10, %v2021_v15 }
 0x207   :  { %3383 = vpow2.f32 %v1655_v30 }
 0x208   :  { %3112 = vmatprep.mubr.bf16.mxu0 %v2081_v41 }
 0x209   :  { %3113 = vmatmul.mubr.bf16.gmra.mrb[40].mxu0 %v2082_v11 }
 0x20e   :  { %v3378_v44 = vpop.eup %3377 }
 0x20f   :  { %v3380_v1 = vpop.eup %3379  ;;  %v2767_v51 = vadd.f32 -1.0, %v3378_v44 }
 0x210   :  { %v2765_v49 = vadd.f32 -1.0, %v3380_v1  ;;  %v3382_v45 = vpop.eup %3381 }
 0x211   :  { %v1835_v2 = vmul.f32 1.6732632, %v2767_v51  ;;  %v3384_v36 = vpop.eup %3383  ;;  %v2768_v26 = vadd.f32 -1.0, %v3382_v45 }
 0x212   :  { %v3042_v18 = vpop.f32.mrb[48].mxu1  ;;  %v1833_v57 = vmul.f32 1.6732632, %v2765_v49  ;;  %v2766_v3 = vadd.f32 -1.0, %v3384_v36 }
 0x213   :  { %v4691_v54 = vadd.f32 %v3042_v18, %v4620_v19  ;;  %v1374_v14 = vpop.f32.mrb[49].mxu1  ;;  %v1963_v34 = vsel %vm1899_vm13, %v1367_v50, %v1835_v2  ;;  %v1836_v40 = vmul.f32 1.6732632, %v2768_v26 }
 0x214   :  { %v4694_v0 = vadd.f32 %v4620_v19, %v1374_v14  ;;  %v3043_v12 = vpop.f32.mrb[50].mxu1  ;;  %v2027_v48 = vmul.f32 1.050701, %v1963_v34  ;;  %v1834_v32 = vmul.f32 1.6732632, %v2766_v3  ;;  %v1961_v9 = vsel %vm1897_vm14, %v4677_v20, %v1833_v57 }
 0x215   :  { %v1583_v31 = vmin.f32 %v4691_v54, 0.0  ;;  %v1377_v25 = vpop.f32.mrb[51].mxu1  ;;  %v4700_v46 = vadd.f32 %v3043_v12, %v4620_v19  ;;  %v1964_v8 = vsel %vm1900_vm15, %v1370_v42, %v1836_v40  ;;  %v2025_v27 = vmul.f32 1.050701, %v1961_v9 }
 0x216   :  { %v1581_v63 = vmin.f32 %v4694_v0, 0.0  ;;  %v4703_v47 = vadd.f32 %v4620_v19, %v1377_v25  ;;  %v2028_v33 = vmul.f32 1.050701, %v1964_v8  ;;  %v1962_v62 = vsel %vm1898_vm0, %v1362_v59, %v1834_v32 }
 0x217   :  { %v1665_v21 = vmul.f32 1.442695, %v1583_v31  ;;  %v1584_v53 = vmin.f32 %v4700_v46, 0.0  ;;  %v2026_v22 = vmul.f32 1.050701, %v1962_v62  ;;  %vm1903_vm1 = vcmp.gt.f32.partialorder %v4691_v54, 0.0 }
 0x218   :  { %v1661_v29 = vmul.f32 1.442695, %v1581_v63  ;;  %v1582_v61 = vmin.f32 %v4703_v47, 0.0  ;;  %v2084_v56 = vpack.c.bf16 %v2028_v33, %v2027_v48  ;;  %vm1901_vm2 = vcmp.gt.f32.partialorder %v4694_v0, 0.0 }
 0x219   :  { %3385 = vpow2.f32 %v1665_v21  ;;  %v1667_v4 = vmul.f32 1.442695, %v1584_v53  ;;  %v2083_v17 = vpack.c.bf16 %v2026_v22, %v2025_v27  ;;  %vm1904_vm3 = vcmp.gt.f32.partialorder %v4700_v46, 0.0 }
 0x21a   :  { %3387 = vpow2.f32 %v1661_v29  ;;  %v3046_v50 = vpop.f32.mrb[52].mxu1  ;;  %v1663_v43 = vmul.f32 1.442695, %v1582_v61  ;;  %vm1902_vm4 = vcmp.gt.f32.partialorder %v4703_v47, 0.0 }
 0x21b   :  { %v4709_v7 = vadd.f32 %v3046_v50, %v4620_v19  ;;  %v1390_v6 = vpop.f32.mrb[53].mxu1  ;;  %3389 = vpow2.f32 %v1667_v4  ;;  %3116 = vmatprep.mubr.bf16.mxu0 %v2083_v17 }
 0x21c   :  { %v4712_v23 = vadd.f32 %v4620_v19, %v1390_v6  ;;  %v3047_v20 = vpop.f32.mrb[54].mxu1  ;;  %3391 = vpow2.f32 %v1663_v43  ;;  %3117 = vmatmul.mubr.bf16.gmra.mrb[44].mxu0 %v2084_v56 }
 0x21d   :  { %v1587_v37 = vmin.f32 %v4709_v7, 0.0  ;;  %v4716_v55 = vadd.f32 %v3047_v20, %v4620_v19  ;;  %v1393_v16 = vpop.f32.mrb[55].mxu1  ;;  %vm1907_vm5 = vcmp.gt.f32.partialorder %v4709_v7, 0.0 }
 0x21e   :  { %v1585_v13 = vmin.f32 %v4712_v23, 0.0  ;;  %v4720_v42 = vadd.f32 %v4620_v19, %v1393_v16  ;;  %vm1905_vm6 = vcmp.gt.f32.partialorder %v4712_v23, 0.0 }
 0x21f   :  { %v1673_v59 = vmul.f32 1.442695, %v1587_v37  ;;  %v1588_v38 = vmin.f32 %v4716_v55, 0.0  ;;  %vm1908_vm7 = vcmp.gt.f32.partialorder %v4716_v55, 0.0 }
 0x220   :  { %v1669_v39 = vmul.f32 1.442695, %v1585_v13  ;;  %v1586_v28 = vmin.f32 %v4720_v42, 0.0  ;;  %vm1906_vm8 = vcmp.gt.f32.partialorder %v4720_v42, 0.0 }
 0x221   :  { %3393 = vpow2.f32 %v1673_v59  ;;  %v1675_v58 = vmul.f32 1.442695, %v1588_v38 }
 0x222   :  { %3395 = vpow2.f32 %v1669_v39  ;;  %v1671_v35 = vmul.f32 1.442695, %v1586_v28 }
 0x223   :  { %v3386_v5 = vpop.eup %3385  ;;  %3397 = vpow2.f32 %v1675_v58 }
 0x224   :  { %v3388_v60 = vpop.eup %3387  ;;  %v2771_v15 = vadd.f32 -1.0, %v3386_v5  ;;  %3399 = vpow2.f32 %v1671_v35 }
 0x225   :  { %v3050_v24 = vpop.f32.mrb[56].mxu1  ;;  %v2769_v44 = vadd.f32 -1.0, %v3388_v60  ;;  %v3390_v18 = vpop.eup %3389 }
 0x226   :  { %v4725_v10 = vadd.f32 %v3050_v24, %v4620_v19  ;;  %v1406_v52 = vpop.f32.mrb[57].mxu1  ;;  %v1839_v41 = vmul.f32 1.6732632, %v2771_v15  ;;  %v3392_v45 = vpop.eup %3391  ;;  %v2772_v12 = vadd.f32 -1.0, %v3390_v18 }
 0x227   :  { %v4728_v11 = vadd.f32 %v4620_v19, %v1406_v52  ;;  %v3051_v30 = vpop.f32.mrb[58].mxu1  ;;  %v2770_v57 = vadd.f32 -1.0, %v3392_v45  ;;  %v1837_v25 = vmul.f32 1.6732632, %v2769_v44 }
 0x228   :  { %v1591_v1 = vmin.f32 %v4725_v10, 0.0  ;;  %v4732_v51 = vadd.f32 %v3051_v30, %v4620_v19  ;;  %v1409_v49 = vpop.f32.mrb[59].mxu1  ;;  %v1967_v31 = vsel %vm1903_vm1, %v4691_v54, %v1839_v41  ;;  %v1840_v40 = vmul.f32 1.6732632, %v2772_v12 }
 0x229   :  { %v1589_v2 = vmin.f32 %v4728_v11, 0.0  ;;  %v4738_v14 = vadd.f32 %v4620_v19, %v1409_v49  ;;  %v1838_v21 = vmul.f32 1.6732632, %v2770_v57  ;;  %v2031_v54 = vmul.f32 1.050701, %v1967_v31 }
 0x22a   :  { %v1681_v36 = vmul.f32 1.442695, %v1591_v1  ;;  %v1592_v34 = vmin.f32 %v4732_v51, 0.0  ;;  %v1965_v50 = vsel %vm1901_vm2, %v4694_v0, %v1837_v25  ;;  %v1968_v20 = vsel %vm1904_vm3, %v4700_v46, %v1840_v40 }
 0x22b   :  { %v1677_v26 = vmul.f32 1.442695, %v1589_v2  ;;  %v3394_v63 = vpop.eup %3393  ;;  %v1590_v48 = vmin.f32 %v4738_v14, 0.0  ;;  %v1966_v8 = vsel %vm1902_vm4, %v4703_v47, %v1838_v21  ;;  %vm1911_vm9 = vcmp.gt.f32.partialorder %v4725_v10, 0.0 }
 0x22c   :  { %3401 = vpow2.f32 %v1681_v36  ;;  %v1683_v3 = vmul.f32 1.442695, %v1592_v34  ;;  %v3396_v32 = vpop.eup %3395  ;;  %v2775_v29 = vadd.f32 -1.0, %v3394_v63  ;;  %v2030_v37 = vmul.f32 1.050701, %v1966_v8 }
 0x22d   :  { %3403 = vpow2.f32 %v1677_v26  ;;  %v3398_v9 = vpop.eup %3397  ;;  %v2773_v53 = vadd.f32 -1.0, %v3396_v32  ;;  %v1679_v33 = vmul.f32 1.442695, %v1590_v48  ;;  %v2029_v39 = vmul.f32 1.050701, %v1965_v50 }
 0x22e   :  { %3405 = vpow2.f32 %v1683_v3  ;;  %v3400_v61 = vpop.eup %3399  ;;  %v1843_v22 = vmul.f32 1.6732632, %v2775_v29  ;;  %v2776_v4 = vadd.f32 -1.0, %v3398_v9  ;;  %v2032_v28 = vmul.f32 1.050701, %v1968_v20 }
 0x22f   :  { %v2774_v56 = vadd.f32 -1.0, %v3400_v61  ;;  %3407 = vpow2.f32 %v1679_v33  ;;  %v1841_v16 = vmul.f32 1.6732632, %v2773_v53  ;;  %vm1912_vm10 = vcmp.gt.f32.partialorder %v4732_v51, 0.0 }
 0x230   :  { %v3054_v62 = vpop.f32.mrb[60].mxu1  ;;  %v1971_v0 = vsel %vm1907_vm5, %v4709_v7, %v1843_v22  ;;  %v1844_v38 = vmul.f32 1.6732632, %v2776_v4  ;;  %vm1909_vm11 = vcmp.gt.f32.partialorder %v4728_v11, 0.0  ;;  %v2085_v52 = vpack.c.bf16 %v2030_v37, %v2029_v39 }
 0x231   :  { %v4756_v6 = vadd.f32 %v3054_v62, %v4620_v19  ;;  %v1422_v43 = vpop.f32.mrb[61].mxu1  ;;  %v1842_v17 = vmul.f32 1.6732632, %v2774_v56  ;;  %v4770_v35 = vmul.f32 1.050701, %v1971_v0  ;;  %v1969_v60 = vsel %vm1905_vm6, %v4712_v23, %v1841_v16 }
 0x232   :  { %v4762_v47 = vadd.f32 %v4620_v19, %v1422_v43  ;;  %v3055_v27 = vpop.f32.mrb[62].mxu1  ;;  %v1972_v41 = vsel %vm1908_vm7, %v4716_v55, %v1844_v38  ;;  %3120 = vmatprep.mubr.bf16.mxu0 %v2085_v52  ;;  %v2086_v12 = vpack.c.bf16 %v2032_v28, %v2031_v54  ;;  %v2033_v53 = vmul.f32 1.050701, %v1969_v60 }
 0x233   :  { %v1595_v13 = vmin.f32 %v4756_v6, 0.0  ;;  %v1425_v59 = vpop.f32.mrb[63].mxu1  ;;  %v4774_v7 = vadd.f32 %v3055_v27, %v4620_v19  ;;  %v1970_v44 = vsel %vm1906_vm8, %v4720_v42, %v1842_v17  ;;  %v2036_v9 = vmul.f32 1.050701, %v1972_v41 }
 0x234   :  { %v1593_v46 = vmin.f32 %v4762_v47, 0.0  ;;  %v4781_v15 = vadd.f32 %v4620_v19, %v1425_v59  ;;  %3121 = vmatmul.mubr.bf16.gmra.mrb[48].mxu0 %v2086_v12  ;;  %v2034_v54 = vmul.f32 1.050701, %v1970_v44  ;;  %vm1910_vm12 = vcmp.gt.f32.partialorder %v4738_v14, 0.0 }
 0x235   :  { %v1689_v58 = vmul.f32 1.442695, %v1595_v13  ;;  %v1596_v49 = vmin.f32 %v4774_v7, 0.0  ;;  %v2088_v0 = vpack.c.bf16 %v2036_v9, %v4770_v35  ;;  %vm1915_vm13 = vcmp.gt.f32.partialorder %v4756_v6, 0.0 }
 0x236   :  { %v1685_v5 = vmul.f32 1.442695, %v1593_v46  ;;  %v3402_v24 = vpop.eup %3401  ;;  %v1594_v45 = vmin.f32 %v4781_v15, 0.0  ;;  %v2087_v37 = vpack.c.bf16 %v2034_v54, %v2033_v53  ;;  %vm1913_vm14 = vcmp.gt.f32.partialorder %v4762_v47, 0.0 }
 0x237   :  { %3409 = vpow2.f32 %v1689_v58  ;;  %v3404_v30 = vpop.eup %3403  ;;  %v2779_v1 = vadd.f32 -1.0, %v3402_v24  ;;  %v1691_v26 = vmul.f32 1.442695, %v1596_v49  ;;  %vm1916_vm15 = vcmp.gt.f32.partialorder %v4774_v7, 0.0 }
 0x238   :  { %v3058_v23 = vpop.f32.mrb[64].mxu1  ;;  %v3406_v18 = vpop.eup %3405  ;;  %v2777_v2 = vadd.f32 -1.0, %v3404_v30  ;;  %3411 = vpow2.f32 %v1685_v5  ;;  %v1687_v25 = vmul.f32 1.442695, %v1594_v45  ;;  %3124 = vmatprep.mubr.bf16.mxu0 %v2087_v37  ;;  %vm1914_vm0 = vcmp.gt.f32.partialorder %v4781_v15, 0.0 }
 0x239   :  { %v1438_v36 = vpop.f32.mrb[65].mxu1  ;;  %v1847_v34 = vmul.f32 1.6732632, %v2779_v1  ;;  %v2780_v57 = vadd.f32 -1.0, %v3406_v18  ;;  %v4792_v55 = vadd.f32 %v3058_v23, %v4620_v19  ;;  %v3408_v21 = vpop.eup %3407  ;;  %3413 = vpow2.f32 %v1691_v26 }
 0x23a   :  { %v3059_v31 = vpop.f32.mrb[66].mxu1  ;;  %v1845_v42 = vmul.f32 1.6732632, %v2777_v2  ;;  %v4795_v3 = vadd.f32 %v4620_v19, %v1438_v36  ;;  %v2778_v8 = vadd.f32 -1.0, %v3408_v21  ;;  %3415 = vpow2.f32 %v1687_v25 }
 0x23b   :  { %v4798_v63 = vadd.f32 %v3059_v31, %v4620_v19  ;;  %v1441_v40 = vpop.f32.mrb[67].mxu1  ;;  %v1975_v48 = vsel %vm1911_vm9, %v4725_v10, %v1847_v34  ;;  %v1848_v32 = vmul.f32 1.6732632, %v2780_v57  ;;  %v1599_v29 = vmin.f32 %v4792_v55, 0.0 }
 0x23c   :  { %v4804_v33 = vmul.f32 1.050701, %v1975_v48  ;;  %v1846_v22 = vmul.f32 1.6732632, %v2778_v8  ;;  %v1597_v10 = vmin.f32 %v4795_v3, 0.0  ;;  %v1973_v4 = vsel %vm1909_vm11, %v4728_v11, %v1845_v42  ;;  %3125 = vmatmul.mubr.bf16.gmra.mrb[52].mxu0 %v2088_v0 }
 0x23d   :  { %v1976_v62 = vsel %vm1912_vm10, %v4732_v51, %v1848_v32  ;;  %v1697_v61 = vmul.f32 1.442695, %v1599_v29  ;;  %v1600_v43 = vmin.f32 %v4798_v63, 0.0  ;;  %v4816_v20 = vadd.f32 %v4620_v19, %v1441_v40 }
 0x23e   :  { %v2040_v50 = vmul.f32 1.050701, %v1976_v62  ;;  %v1974_v51 = vsel %vm1910_vm12, %v4738_v14, %v1846_v22  ;;  %v1693_v27 = vmul.f32 1.442695, %v1597_v10  ;;  %v2037_v17 = vmul.f32 1.050701, %v1973_v4 }
 0x23f   :  { %3417 = vpow2.f32 %v1697_v61  ;;  %v2038_v16 = vmul.f32 1.050701, %v1974_v51  ;;  %v1699_v13 = vmul.f32 1.442695, %v1600_v43  ;;  %v1598_v59 = vmin.f32 %v4816_v20, 0.0 }
 0x240   :  { %3419 = vpow2.f32 %v1693_v27  ;;  %v2090_v46 = vpack.c.bf16 %v2040_v50, %v4804_v33  ;;  %vm1919_vm1 = vcmp.gt.f32.partialorder %v4792_v55, 0.0  ;;  %vm1917_vm2 = vcmp.gt.f32.partialorder %v4795_v3, 0.0 }
 0x241   :  { %v3410_v56 = vpop.eup %3409  ;;  %3421 = vpow2.f32 %v1699_v13  ;;  %v1695_v28 = vmul.f32 1.442695, %v1598_v59  ;;  %v2089_v24 = vpack.c.bf16 %v2038_v16, %v2037_v17  ;;  %vm1920_vm3 = vcmp.gt.f32.partialorder %v4798_v63, 0.0 }
 0x242   :  { %v3412_v38 = vpop.eup %3411  ;;  %v2783_v39 = vadd.f32 -1.0, %v3410_v56  ;;  %vm1918_vm4 = vcmp.gt.f32.partialorder %v4816_v20, 0.0 }
 0x243   :  { %v3414_v60 = vpop.eup %3413  ;;  %3423 = vpow2.f32 %v1695_v28  ;;  %3128 = vmatprep.mubr.bf16.mxu0 %v2089_v24  ;;  %v2781_v23 = vadd.f32 -1.0, %v3412_v38 }
 0x244   :  { %v3062_v11 = vpop.f32.mrb[68].mxu1  ;;  %v3416_v41 = vpop.eup %3415  ;;  %v2784_v44 = vadd.f32 -1.0, %v3414_v60  ;;  %v1851_v49 = vmul.f32 1.6732632, %v2783_v39  ;;  %3129 = vmatmul.mubr.bf16.gmra.mrb[56].mxu0 %v2090_v46 }
 0x245   :  { %v4823_v14 = vadd.f32 %v3062_v11, %v4620_v19  ;;  %v1454_v58 = vpop.f32.mrb[69].mxu1  ;;  %v2782_v18 = vadd.f32 -1.0, %v3416_v41  ;;  %v1849_v40 = vmul.f32 1.6732632, %v2781_v23 }
 0x246   :  { %v4826_v35 = vadd.f32 %v4620_v19, %v1454_v58  ;;  %v3063_v5 = vpop.f32.mrb[70].mxu1  ;;  %v1852_v45 = vmul.f32 1.6732632, %v2784_v44  ;;  %v1979_v25 = vsel %vm1915_vm13, %v4756_v6, %v1851_v49 }
 0x247   :  { %v1603_v52 = vmin.f32 %v4823_v14, 0.0  ;;  %v1457_v30 = vpop.f32.mrb[71].mxu1  ;;  %v4832_v36 = vadd.f32 %v3063_v5, %v4620_v19  ;;  %v1850_v21 = vmul.f32 1.6732632, %v2782_v18  ;;  %v2043_v22 = vmul.f32 1.050701, %v1979_v25 }
 0x248   :  { %v1601_v1 = vmin.f32 %v4826_v35, 0.0  ;;  %v4835_v34 = vadd.f32 %v4620_v19, %v1457_v30  ;;  %v1980_v9 = vsel %vm1916_vm15, %v4774_v7, %v1852_v45  ;;  %v1977_v56 = vsel %vm1913_vm14, %v4762_v47, %v1849_v40 }
 0x249   :  { %v1705_v2 = vmul.f32 1.442695, %v1603_v52  ;;  %v3418_v57 = vpop.eup %3417  ;;  %v1604_v31 = vmin.f32 %v4832_v36, 0.0  ;;  %v2044_v51 = vmul.f32 1.050701, %v1980_v9  ;;  %v1978_v27 = vsel %vm1914_vm0, %v4781_v15, %v1850_v21 }
 0x24a   :  { %v1701_v12 = vmul.f32 1.442695, %v1601_v1  ;;  %v2787_v26 = vadd.f32 -1.0, %v3418_v57  ;;  %v1602_v48 = vmin.f32 %v4835_v34, 0.0  ;;  %v3420_v29 = vpop.eup %3419  ;;  %v2042_v11 = vmul.f32 1.050701, %v1978_v27 }
 0x24b   :  { %3425 = vpow2.f32 %v1705_v2  ;;  %v1707_v8 = vmul.f32 1.442695, %v1604_v31  ;;  %v3422_v33 = vpop.eup %3421  ;;  %v2785_v62 = vadd.f32 -1.0, %v3420_v29  ;;  %vm1923_vm5 = vcmp.gt.f32.partialorder %v4823_v14, 0.0 }
 0x24c   :  { %3427 = vpow2.f32 %v1701_v12  ;;  %v3066_v42 = vpop.f32.mrb[72].mxu1  ;;  %v1855_v54 = vmul.f32 1.6732632, %v2787_v26  ;;  %v1703_v61 = vmul.f32 1.442695, %v1602_v48  ;;  %v2788_v10 = vadd.f32 -1.0, %v3422_v33 }
 0x24d   :  { %v1470_v32 = vpop.f32.mrb[73].mxu1  ;;  %v4848_v53 = vadd.f32 %v3066_v42, %v4620_v19  ;;  %3429 = vpow2.f32 %v1707_v8  ;;  %v3424_v43 = vpop.eup %3423  ;;  %v1853_v59 = vmul.f32 1.6732632, %v2785_v62  ;;  %v2092_v45 = vpack.c.bf16 %v2044_v51, %v2043_v22 }
 0x24e   :  { %v4852_v6 = vadd.f32 %v4620_v19, %v1470_v32  ;;  %v3067_v50 = vpop.f32.mrb[74].mxu1  ;;  %3431 = vpow2.f32 %v1703_v61  ;;  %v1983_v37 = vsel %vm1919_vm1, %v4792_v55, %v1855_v54  ;;  %v2786_v0 = vadd.f32 -1.0, %v3424_v43 }
 0x24f   :  { %v1607_v4 = vmin.f32 %v4848_v53, 0.0  ;;  %v1473_v7 = vpop.f32.mrb[75].mxu1  ;;  %v1856_v38 = vmul.f32 1.6732632, %v2788_v10  ;;  %v4866_v17 = vadd.f32 %v3067_v50, %v4620_v19  ;;  %v2041_v55 = vmul.f32 1.050701, %v1977_v56 }
 0x250   :  { %v1605_v13 = vmin.f32 %v4852_v6, 0.0  ;;  %v4869_v47 = vadd.f32 %v4620_v19, %v1473_v7  ;;  %v1854_v15 = vmul.f32 1.6732632, %v2786_v0  ;;  %v4874_v24 = vmul.f32 1.050701, %v1983_v37 }
 0x251   :  { %v1713_v16 = vmul.f32 1.442695, %v1607_v4  ;;  %v1608_v58 = vmin.f32 %v4866_v17, 0.0  ;;  %v1981_v41 = vsel %vm1917_vm2, %v4795_v3, %v1853_v59  ;;  %v1984_v44 = vsel %vm1920_vm3, %v4798_v63, %v1856_v38 }
 0x252   :  { %v1709_v28 = vmul.f32 1.442695, %v1605_v13  ;;  %v1606_v52 = vmin.f32 %v4869_v47, 0.0  ;;  %v1982_v23 = vsel %vm1918_vm4, %v4816_v20, %v1854_v15  ;;  %v2091_v2 = vpack.c.bf16 %v2042_v11, %v2041_v55 }
 0x253   :  { %3433 = vpow2.f32 %v1713_v16  ;;  %v1715_v1 = vmul.f32 1.442695, %v1608_v58  ;;  %v2045_v40 = vmul.f32 1.050701, %v1981_v41  ;;  %v2048_v21 = vmul.f32 1.050701, %v1984_v44 }
 0x254   :  { %v3070_v46 = vpop.f32.mrb[76].mxu1  ;;  %3435 = vpow2.f32 %v1709_v28  ;;  %v1711_v18 = vmul.f32 1.442695, %v1606_v52  ;;  %3132 = vmatprep.mubr.bf16.mxu0 %v2091_v2  ;;  %v2046_v29 = vmul.f32 1.050701, %v1982_v23  ;;  %vm1921_vm6 = vcmp.gt.f32.partialorder %v4826_v35, 0.0 }
 0x255   :  { %v3426_v39 = vpop.eup %3425  ;;  %v1486_v30 = vpop.f32.mrb[77].mxu1  ;;  %3437 = vpow2.f32 %v1715_v1  ;;  %v4886_v26 = vadd.f32 %v3070_v46, %v4620_v19  ;;  %3133 = vmatmul.mubr.bf16.gmra.mrb[60].mxu0 %v2092_v45  ;;  %vm1924_vm7 = vcmp.gt.f32.partialorder %v4832_v36, 0.0  ;;  %vm1922_vm8 = vcmp.gt.f32.partialorder %v4835_v34, 0.0 }
 0x256   :  { %v3428_v5 = vpop.eup %3427  ;;  %v2791_v60 = vadd.f32 -1.0, %v3426_v39  ;;  %v3071_v49 = vpop.f32.mrb[78].mxu1  ;;  %v4889_v3 = vadd.f32 %v4620_v19, %v1486_v30  ;;  %3439 = vpow2.f32 %v1711_v18  ;;  %vm1927_vm9 = vcmp.gt.f32.partialorder %v4848_v53, 0.0  ;;  %v4921_v39 = vld [vmem:[%s5158_s4] ss:$0 sm:$0xff] }
 0x257   :  { %v1489_v12 = vpop.f32.mrb[79].mxu1  ;;  %v2789_v57 = vadd.f32 -1.0, %v3428_v5  ;;  %v3430_v31 = vpop.eup %3429  ;;  %v4892_v63 = vadd.f32 %v3071_v49, %v4620_v19  ;;  %v1611_v32 = vmin.f32 %v4886_v26, 0.0  ;;  %vm1925_vm10 = vcmp.gt.f32.partialorder %v4852_v6, 0.0 }
 0x258   :  { %v1859_v42 = vmul.f32 1.6732632, %v2791_v60  ;;  %v4895_v20 = vadd.f32 %v4620_v19, %v1489_v12  ;;  %v3432_v25 = vpop.eup %3431  ;;  %v2792_v48 = vadd.f32 -1.0, %v3430_v31  ;;  %v1609_v54 = vmin.f32 %v4889_v3, 0.0 }
 0x259   :  { %v2790_v9 = vadd.f32 -1.0, %v3432_v25  ;;  %v1857_v33 = vmul.f32 1.6732632, %v2789_v57  ;;  %v1721_v62 = vmul.f32 1.442695, %v1611_v32  ;;  %v1612_v19 = vmin.f32 %v4892_v63, 0.0 }
 0x25a   :  { %v1987_v50 = vsel %vm1923_vm5, %v4823_v14, %v1859_v42  ;;  %v1717_v10 = vmul.f32 1.442695, %v1609_v54  ;;  %v1610_v4 = vmin.f32 %v4895_v20, 0.0  ;;  %v1860_v7 = vmul.f32 1.6732632, %v2792_v48 }
 0x25b   :  { %v1858_v22 = vmul.f32 1.6732632, %v2790_v9  ;;  %3441 = vpow2.f32 %v1721_v62  ;;  %v1723_v43 = vmul.f32 1.442695, %v1612_v19  ;;  %v4909_v14 = vmul.f32 1.050701, %v1987_v50 }
 0x25c   :  { %v3074_v8 = vpop.f32.mrb[80].mxu1  ;;  %3443 = vpow2.f32 %v1717_v10  ;;  %v1719_v37 = vmul.f32 1.442695, %v1610_v4  ;;  %v1985_v13 = vsel %vm1921_vm6, %v4826_v35, %v1857_v33  ;;  %vm1928_vm11 = vcmp.gt.f32.partialorder %v4866_v17, 0.0 }
 0x25d   :  { %v3434_v61 = vpop.eup %3433  ;;  %v1502_v56 = vpop.f32.mrb[81].mxu1  ;;  %v1986_v51 = vsel %vm1922_vm8, %v4835_v34, %v1858_v22  ;;  %3445 = vpow2.f32 %v1723_v43  ;;  %v2093_v38 = vpack.c.bf16 %v2046_v29, %v2045_v40  ;;  %v2094_v11 = vpack.c.bf16 %v2048_v21, %v4874_v24 }
 0x25e   :  { %v2795_v27 = vadd.f32 -1.0, %v3434_v61  ;;  %v3075_v0 = vpop.f32.mrb[82].mxu1  ;;  %v3436_v16 = vpop.eup %3435  ;;  %3447 = vpow2.f32 %v1719_v37  ;;  %v2050_v46 = vmul.f32 1.050701, %v1986_v51  ;;  %vm1926_vm12 = vcmp.gt.f32.partialorder %v4869_v47, 0.0 }
 0x25f   :  { %v1505_v59 = vpop.f32.mrb[83].mxu1  ;;  %v2793_v34 = vadd.f32 -1.0, %v3436_v16  ;;  %v3438_v15 = vpop.eup %3437  ;;  %v4924_v35 = vadd.f32 %v4921_v39, %v3074_v8  ;;  %v4927_v55 = vadd.f32 %v4921_v39, %v1502_v56  ;;  %v4930_v28 = vadd.f32 %v4921_v39, %v3075_v0  ;;  %3136 = vmatprep.mubr.bf16.mxu0 %v2093_v38 }
 0x260   :  { %v3440_v58 = vpop.eup %3439  ;;  %v2049_v5 = vmul.f32 1.050701, %v1985_v13  ;;  %v1988_v24 = vsel %vm1924_vm7, %v4832_v36, %v1860_v7  ;;  %v1863_v60 = vmul.f32 1.6732632, %v2795_v27  ;;  %v2796_v52 = vadd.f32 -1.0, %v3438_v15  ;;  %3137 = vmatmul.mubr.bf16.gmra.mrb[64].mxu0 %v2094_v11 }
 0x261   :  { %v2794_v41 = vadd.f32 -1.0, %v3440_v58  ;;  %v1615_v44 = vmin.f32 %v4924_v35, 0.0  ;;  %v1613_v1 = vmin.f32 %v4927_v55, 0.0  ;;  %v4938_v49 = vadd.f32 %v4921_v39, %v1505_v59 }
 0x262   :  { %v1861_v18 = vmul.f32 1.6732632, %v2793_v34  ;;  %v1864_v2 = vmul.f32 1.6732632, %v2796_v52  ;;  %v1616_v45 = vmin.f32 %v4930_v28, 0.0  ;;  %v2095_v42 = vpack.c.bf16 %v2050_v46, %v2049_v5 }
 0x263   :  { %v2052_v36 = vmul.f32 1.050701, %v1988_v24  ;;  %v1862_v57 = vmul.f32 1.6732632, %v2794_v41  ;;  %v1729_v31 = vmul.f32 1.442695, %v1615_v44  ;;  %v1991_v32 = vsel %vm1927_vm9, %v4848_v53, %v1863_v60 }
 0x264   :  { %v3078_v30 = vpop.f32.mrb[84].mxu1  ;;  %vm1931_vm13 = vcmp.gt.f32.partialorder %v4886_v26, 0.0  ;;  %v1725_v25 = vmul.f32 1.442695, %v1613_v1  ;;  %v1731_v40 = vmul.f32 1.442695, %v1616_v45  ;;  %3140 = vmatprep.mubr.bf16.mxu0 %v2095_v42  ;;  %v1989_v54 = vsel %vm1925_vm10, %v4852_v6, %v1861_v18 }
 0x265   :  { %v1518_v23 = vpop.f32.mrb[85].mxu1  ;;  %v3442_v48 = vpop.eup %3441  ;;  %vm1929_vm14 = vcmp.gt.f32.partialorder %v4889_v3, 0.0  ;;  %3449 = vpow2.f32 %v1729_v31  ;;  %v1614_v29 = vmin.f32 %v4938_v49, 0.0  ;;  %v1992_v8 = vsel %vm1928_vm11, %v4866_v17, %v1864_v2 }
 0x266   :  { %v3079_v12 = vpop.f32.mrb[86].mxu1  ;;  %v3444_v9 = vpop.eup %3443  ;;  %v2799_v33 = vadd.f32 -1.0, %v3442_v48  ;;  %3451 = vpow2.f32 %v1725_v25  ;;  %vm1930_vm15 = vcmp.gt.f32.partialorder %v4895_v20, 0.0  ;;  %v2096_v61 = vpack.c.bf16 %v2052_v36, %v4909_v14 }
 0x267   :  { %v1521_v21 = vpop.f32.mrb[87].mxu1  ;;  %v3446_v62 = vpop.eup %3445  ;;  %v2797_v19 = vadd.f32 -1.0, %v3444_v9  ;;  %3453 = vpow2.f32 %v1731_v40  ;;  %v1727_v53 = vmul.f32 1.442695, %v1614_v29  ;;  %v1990_v22 = vsel %vm1926_vm12, %v4869_v47, %v1862_v57 }
 0x268   :  { %v3448_v50 = vpop.eup %3447  ;;  %v1867_v6 = vmul.f32 1.6732632, %v2799_v33  ;;  %v4959_v10 = vadd.f32 %v4921_v39, %v3078_v30  ;;  %v4962_v17 = vadd.f32 %v4921_v39, %v1518_v23  ;;  %v2800_v7 = vadd.f32 -1.0, %v3446_v62  ;;  %3141 = vmatmul.mubr.bf16.gmra.mrb[68].mxu0 %v2096_v61 }
 0x269   :  { %v2798_v43 = vadd.f32 -1.0, %v3448_v50  ;;  %3455 = vpow2.f32 %v1727_v53  ;;  %v4965_v56 = vadd.f32 %v4921_v39, %v3079_v12  ;;  %v2055_v27 = vmul.f32 1.050701, %v1991_v32 }
 0x26a   :  { %v1865_v37 = vmul.f32 1.6732632, %v2797_v19  ;;  %vm1932_vm0 = vcmp.gt.f32.partialorder %v4892_v63, 0.0  ;;  %v1619_v47 = vmin.f32 %v4959_v10, 0.0  ;;  %v2056_v16 = vmul.f32 1.050701, %v1992_v8 }
 0x26b   :  { %v2054_v14 = vmul.f32 1.050701, %v1990_v22  ;;  %v1995_v13 = vsel %vm1931_vm13, %v4886_v26, %v1867_v6  ;;  %v1617_v59 = vmin.f32 %v4962_v17, 0.0  ;;  %v2053_v38 = vmul.f32 1.050701, %v1989_v54 }
 0x26c   :  { %v3082_v4 = vpop.f32.mrb[88].mxu1  ;;  %v1866_v11 = vmul.f32 1.6732632, %v2798_v43  ;;  %v1737_v15 = vmul.f32 1.442695, %v1619_v47  ;;  %vm1935_vm1 = vcmp.gt.f32.partialorder %v4924_v35, 0.0  ;;  %v1993_v60 = vsel %vm1929_vm14, %v4889_v3, %v1865_v37 }
 0x26d   :  { %v1534_v51 = vpop.f32.mrb[89].mxu1  ;;  %v1868_v46 = vmul.f32 1.6732632, %v2800_v7  ;;  %v1733_v58 = vmul.f32 1.442695, %v1617_v59  ;;  %v1620_v5 = vmin.f32 %v4965_v56, 0.0  ;;  %v4981_v26 = vadd.f32 %v4921_v39, %v1521_v21 }
 0x26e   :  { %v3083_v0 = vpop.f32.mrb[90].mxu1  ;;  %v4975_v24 = vmul.f32 1.050701, %v1995_v13  ;;  %3457 = vpow2.f32 %v1737_v15  ;;  %vm1933_vm2 = vcmp.gt.f32.partialorder %v4927_v55, 0.0  ;;  %v2097_v41 = vpack.c.bf16 %v2054_v14, %v2053_v38 }
 0x26f   :  { %v1537_v34 = vpop.f32.mrb[91].mxu1  ;;  %v3450_v52 = vpop.eup %3449  ;;  %3459 = vpow2.f32 %v1733_v58  ;;  %v1739_v30 = vmul.f32 1.442695, %v1620_v5  ;;  %v2098_v44 = vpack.c.bf16 %v2056_v16, %v2055_v27  ;;  %v1994_v23 = vsel %vm1930_vm15, %v4895_v20, %v1866_v11 }
 0x270   :  { %v3452_v1 = vpop.eup %3451  ;;  %v2803_v18 = vadd.f32 -1.0, %v3450_v52  ;;  %vm1936_vm3 = vcmp.gt.f32.partialorder %v4930_v28, 0.0  ;;  %vm1934_vm4 = vcmp.gt.f32.partialorder %v4938_v49, 0.0  ;;  %v1618_v3 = vmin.f32 %v4981_v26, 0.0  ;;  %3144 = vmatprep.mubr.bf16.mxu0 %v2097_v41 }
 0x271   :  { %v4991_v2 = vadd.f32 %v4921_v39, %v3082_v4  ;;  %v3454_v12 = vpop.eup %3453  ;;  %v2801_v36 = vadd.f32 -1.0, %v3452_v1  ;;  %3461 = vpow2.f32 %v1739_v30  ;;  %v4994_v57 = vadd.f32 %v4921_v39, %v1534_v51  ;;  %3145 = vmatmul.mubr.bf16.gmra.mrb[72].mxu0 %v2098_v44 }
 0x272   :  { %v4997_v20 = vadd.f32 %v4921_v39, %v3083_v0  ;;  %v1871_v42 = vmul.f32 1.6732632, %v2803_v18  ;;  %v2804_v25 = vadd.f32 -1.0, %v3454_v12  ;;  %v1735_v40 = vmul.f32 1.442695, %v1618_v3 }
 0x273   :  { %v1623_v21 = vmin.f32 %v4991_v2, 0.0  ;;  %v3456_v48 = vpop.eup %3455  ;;  %v2057_v32 = vmul.f32 1.050701, %v1993_v60  ;;  %v1996_v29 = vsel %vm1932_vm0, %v4892_v63, %v1868_v46  ;;  %v2058_v9 = vmul.f32 1.050701, %v1994_v23 }
 0x274   :  { %v3086_v45 = vpop.f32.mrb[92].mxu1  ;;  %v1621_v54 = vmin.f32 %v4994_v57, 0.0  ;;  %v1999_v33 = vsel %vm1935_vm1, %v4924_v35, %v1871_v42  ;;  %v1869_v62 = vmul.f32 1.6732632, %v2801_v36  ;;  %v2802_v19 = vadd.f32 -1.0, %v3456_v48 }
 0x275   :  { %v1550_v31 = vpop.f32.mrb[93].mxu1  ;;  %vm1939_vm5 = vcmp.gt.f32.partialorder %v4959_v10, 0.0  ;;  %3463 = vpow2.f32 %v1735_v40  ;;  %v1872_v61 = vmul.f32 1.6732632, %v2804_v25  ;;  %v1745_v50 = vmul.f32 1.442695, %v1623_v21 }
 0x276   :  { %v3087_v8 = vpop.f32.mrb[94].mxu1  ;;  %v1741_v22 = vmul.f32 1.442695, %v1621_v54  ;;  %v2060_v6 = vmul.f32 1.050701, %v1996_v29  ;;  %vm1937_vm6 = vcmp.gt.f32.partialorder %v4962_v17, 0.0  ;;  %v5014_v35 = vadd.f32 %v4921_v39, %v1537_v34 }
 0x277   :  { %v1553_v53 = vpop.f32.mrb[95].mxu1  ;;  %v1870_v4 = vmul.f32 1.6732632, %v2802_v19  ;;  %v1624_v63 = vmin.f32 %v4997_v20, 0.0  ;;  %v5010_v7 = vmul.f32 1.050701, %v1999_v33  ;;  %3465 = vpow2.f32 %v1745_v50 }
 0x278   :  { %vm1940_vm7 = vcmp.gt.f32.partialorder %v4965_v56, 0.0  ;;  %v3458_v43 = vpop.eup %3457  ;;  %v1997_v51 = vsel %vm1933_vm2, %v4927_v55, %v1869_v62  ;;  %3467 = vpow2.f32 %v1741_v22  ;;  %v2099_v37 = vpack.c.bf16 %v2058_v9, %v2057_v32 }
 0x279   :  { %v1747_v27 = vmul.f32 1.442695, %v1624_v63  ;;  %v3460_v47 = vpop.eup %3459  ;;  %v2000_v0 = vsel %vm1936_vm3, %v4930_v28, %v1872_v61  ;;  %v1998_v16 = vsel %vm1934_vm4, %v4938_v49, %v1870_v4  ;;  %v2807_v14 = vadd.f32 -1.0, %v3458_v43 }
 0x27a   :  { %v1622_v13 = vmin.f32 %v5014_v35, 0.0  ;;  %v2805_v59 = vadd.f32 -1.0, %v3460_v47  ;;  %vm1938_vm8 = vcmp.gt.f32.partialorder %v4981_v26, 0.0  ;;  %3148 = vmatprep.mubr.bf16.mxu0 %v2099_v37  ;;  %v2100_v55 = vpack.c.bf16 %v2060_v6, %v4975_v24 }
 0x27b   :  { %3469 = vpow2.f32 %v1747_v27  ;;  %v5029_v34 = vadd.f32 %v4921_v39, %v3086_v45  ;;  %v3462_v38 = vpop.eup %3461  ;;  %v1875_v11 = vmul.f32 1.6732632, %v2807_v14  ;;  %v5032_v15 = vadd.f32 %v4921_v39, %v1550_v31 }
 0x27c   :  { %v1743_v28 = vmul.f32 1.442695, %v1622_v13  ;;  %v5035_v49 = vadd.f32 %v4921_v39, %v3087_v8  ;;  %v2061_v46 = vmul.f32 1.050701, %v1997_v51  ;;  %v1873_v58 = vmul.f32 1.6732632, %v2805_v59  ;;  %3149 = vmatmul.mubr.bf16.gmra.mrb[76].mxu0 %v2100_v55 }
 0x27d   :  { %v2808_v5 = vadd.f32 -1.0, %v3462_v38  ;;  %v1627_v60 = vmin.f32 %v5029_v34, 0.0  ;;  %v2064_v52 = vmul.f32 1.050701, %v2000_v0  ;;  %v2003_v24 = vsel %vm1939_vm5, %v4959_v10, %v1875_v11 }
 0x27e   :  { %3471 = vpow2.f32 %v1743_v28  ;;  %v1625_v30 = vmin.f32 %v5032_v15, 0.0  ;;  %v2062_v44 = vmul.f32 1.050701, %v1998_v16  ;;  %v2001_v18 = vsel %vm1937_vm6, %v4962_v17, %v1873_v58 }
 0x27f   :  { %v3464_v41 = vpop.eup %3463  ;;  %v1876_v1 = vmul.f32 1.6732632, %v2808_v5  ;;  %v1753_v23 = vmul.f32 1.442695, %v1627_v60  ;;  %v1628_v12 = vmin.f32 %v5035_v49, 0.0  ;;  %v5050_v31 = vadd.f32 %v4921_v39, %v1553_v53 }
 0x280   :  { %v2806_v3 = vadd.f32 -1.0, %v3464_v41  ;;  %v1749_v45 = vmul.f32 1.442695, %v1625_v30  ;;  %v2067_v36 = vmul.f32 1.050701, %v2003_v24  ;;  %v2101_v9 = vpack.c.bf16 %v2062_v44, %v2061_v46 }
 0x281   :  { %v2004_v10 = vsel %vm1940_vm7, %v4965_v56, %v1876_v1  ;;  %3473 = vpow2.f32 %v1753_v23  ;;  %v3466_v42 = vpop.eup %3465  ;;  %v1755_v21 = vmul.f32 1.442695, %v1628_v12  ;;  %v2065_v17 = vmul.f32 1.050701, %v2001_v18 }
 0x282   :  { %v2068_v25 = vmul.f32 1.050701, %v2004_v10  ;;  %v1874_v40 = vmul.f32 1.6732632, %v2806_v3  ;;  %3475 = vpow2.f32 %v1749_v45  ;;  %v3468_v48 = vpop.eup %3467  ;;  %v2811_v32 = vadd.f32 -1.0, %v3466_v42  ;;  %3152 = vmatprep.mubr.bf16.mxu0 %v2101_v9 }
 0x283   :  { %v1626_v29 = vmin.f32 %v5050_v31, 0.0  ;;  %v2809_v56 = vadd.f32 -1.0, %v3468_v48  ;;  %3477 = vpow2.f32 %v1755_v21  ;;  %v2102_v39 = vpack.c.bf16 %v2064_v52, %v5010_v7 }
 0x284   :  { %v2002_v54 = vsel %vm1938_vm8, %v4981_v26, %v1874_v40  ;;  %v1879_v62 = vmul.f32 1.6732632, %v2811_v32  ;;  %v2104_v53 = vpack.c.bf16 %v2068_v25, %v2067_v36  ;;  %vm1943_vm9 = vcmp.gt.f32.partialorder %v4991_v2, 0.0 }
 0x285   :  { %v3470_v8 = vpop.eup %3469  ;;  %v2066_v33 = vmul.f32 1.050701, %v2002_v54  ;;  %v1751_v19 = vmul.f32 1.442695, %v1626_v29  ;;  %3153 = vmatmul.mubr.bf16.gmra.mrb[80].mxu0 %v2102_v39  ;;  %v1877_v50 = vmul.f32 1.6732632, %v2809_v56 }
 0x286   :  { %v2812_v61 = vadd.f32 -1.0, %v3470_v8  ;;  %v2007_v26 = vsel %vm1943_vm9, %v4991_v2, %v1879_v62  ;;  %vm1944_vm10 = vcmp.gt.f32.partialorder %v4997_v20, 0.0  ;;  %vm1941_vm11 = vcmp.gt.f32.partialorder %v4994_v57, 0.0 }
 0x287   :  { %3479 = vpow2.f32 %v1751_v19  ;;  %v2103_v22 = vpack.c.bf16 %v2066_v33, %v2065_v17  ;;  %v2071_v51 = vmul.f32 1.050701, %v2007_v26  ;;  %v2005_v27 = vsel %vm1941_vm11, %v4994_v57, %v1877_v50 }
 0x288   :  { %v3472_v6 = vpop.eup %3471  ;;  %v1880_v4 = vmul.f32 1.6732632, %v2812_v61  ;;  %vm1942_vm12 = vcmp.gt.f32.partialorder %v5014_v35, 0.0  ;;  %v2069_v55 = vmul.f32 1.050701, %v2005_v27  ;;  %vm1947_vm13 = vcmp.gt.f32.partialorder %v5029_v34, 0.0 }
 0x289   :  { %v2810_v63 = vadd.f32 -1.0, %v3472_v6  ;;  %3156 = vmatprep.mubr.bf16.mxu0 %v2103_v22  ;;  %vm1948_vm14 = vcmp.gt.f32.partialorder %v5035_v49, 0.0  ;;  %vm1945_vm15 = vcmp.gt.f32.partialorder %v5032_v15, 0.0  ;;  %vm1946_vm0 = vcmp.gt.f32.partialorder %v5050_v31, 0.0 }
 0x28a   :  { %v2008_v7 = vsel %vm1944_vm10, %v4997_v20, %v1880_v4 }
 0x28b   :  { %v3474_v43 = vpop.eup %3473  ;;  %v2072_v37 = vmul.f32 1.050701, %v2008_v7  ;;  %v1878_v47 = vmul.f32 1.6732632, %v2810_v63 }
 0x28c   :  { %v3476_v0 = vpop.eup %3475  ;;  %v2815_v16 = vadd.f32 -1.0, %v3474_v43 }
 0x28d   :  { %v2006_v2 = vsel %vm1942_vm12, %v5014_v35, %v1878_v47  ;;  %v2813_v14 = vadd.f32 -1.0, %v3476_v0  ;;  %v2106_v13 = vpack.c.bf16 %v2072_v37, %v2071_v51  ;;  %v3478_v59 = vpop.eup %3477  ;;  %3157 = vmatmul.mubr.bf16.gmra.mrb[84].mxu0 %v2104_v53 }
 0x28e   :  { %v2070_v38 = vmul.f32 1.050701, %v2006_v2  ;;  %v1883_v11 = vmul.f32 1.6732632, %v2815_v16  ;;  %v2816_v20 = vadd.f32 -1.0, %v3478_v59 }
 0x28f   :  { %v1881_v28 = vmul.f32 1.6732632, %v2813_v14 }
 0x290   :  { %v2105_v57 = vpack.c.bf16 %v2070_v38, %v2069_v55  ;;  %v2011_v58 = vsel %vm1947_vm13, %v5029_v34, %v1883_v11  ;;  %v1884_v5 = vmul.f32 1.6732632, %v2816_v20 }
 0x291   :  { %v3480_v46 = vpop.eup %3479  ;;  %v2075_v52 = vmul.f32 1.050701, %v2011_v58  ;;  %v2009_v24 = vsel %vm1945_vm15, %v5032_v15, %v1881_v28 }
 0x292   :  { %v2814_v60 = vadd.f32 -1.0, %v3480_v46  ;;  %3160 = vmatprep.mubr.bf16.mxu0 %v2105_v57  ;;  %v2012_v35 = vsel %vm1948_vm14, %v5035_v49, %v1884_v5  ;;  %v2073_v1 = vmul.f32 1.050701, %v2009_v24  ;;  %v5076_v49 = vld [vmem:[%s5160_s6] ss:$0 sm:$0xff]  ;;  %s3635_s6 = smov [#allocation2]  }
 0x293   :  { %v2076_v30 = vmul.f32 1.050701, %v2012_v35  ;;  %s2602_s1 = sshll.u32 %s3635_s6, 4  ;;  %s2603_s1 = int_to_ptr.vmem [resolvable:$true] %s2602_s1 }
 0x294   :  { %v1882_v41 = vmul.f32 1.6732632, %v2814_v60  ;;  %s3611_s10 = scalar_lea.vmem %s2603_s1, 8192  ;;  %p3616_p1 = scmp.lt.s32.totalorder %s2603_s1, %s2603_s1 }
 0x295   :  { %3161 = vmatmul.mubr.bf16.gmra.mrb[88].mxu0 %v2106_v13  ;;  %v2108_v34 = vpack.c.bf16 %v2076_v30, %v2075_v52  ;;  %p3612_p0 = scmp.ne.s32.totalorder %s2603_s1, %s3611_s10  ;;  %p3617_p2 = scmp.lt.s32.totalorder %s3611_s10, %s3611_s10 }
 0x296   :  { %v2010_v44 = vsel %vm1946_vm0, %v5050_v31, %v1882_v41 }
 0x297   :  { %v2074_v23 = vmul.f32 1.050701, %v2010_v44  ;;  %p3618_p3 = por %p3617_p2, %p3616_p1 }
 0x299   :  { %v2107_v18 = vpack.c.bf16 %v2074_v23, %v2073_v1  ;;  %p3619_p4 = pnand %p3618_p3, %p3612_p0 }
 0x29b   :  { %3164 = vmatprep.mubr.bf16.mxu0 %v2107_v18 }
 0x29d   :  { %3165 = vmatmul.mubr.bf16.gmra.mrb[92].mxu0 %v2108_v34 }
 0x2c6   :  { %v3106_v3 = vpop.f32.mrb[32].mxu0 }
 0x2c7   :  { %v2223_v15 = vadd.f32 %v3106_v3, %v5076_v49  ;;  %v2214_v45 = vpop.f32.mrb[33].mxu0 }
 0x2c8   :  { %v2215_v12 = vadd.f32 %v5076_v49, %v2214_v45  ;;  %v3107_v36 = vpop.f32.mrb[34].mxu0 }
 0x2c9   :  { %3481 = vtanh.f32 %v2223_v15  ;;  %v2226_v10 = vadd.f32 %v3107_v36, %v5076_v49  ;;  %v2217_v31 = vpop.f32.mrb[35].mxu0 }
 0x2ca   :  { %3483 = vtanh.f32 %v2215_v12  ;;  %v2218_v42 = vadd.f32 %v5076_v49, %v2217_v31 }
 0x2cb   :  { %3485 = vtanh.f32 %v2226_v10 }
 0x2cc   :  { %3487 = vtanh.f32 %v2218_v42 }
 0x2ce   :  { %v3110_v25 = vpop.f32.mrb[36].mxu0 }
 0x2cf   :  { %v2239_v40 = vadd.f32 %v3110_v25, %v5076_v49  ;;  %v2230_v21 = vpop.f32.mrb[37].mxu0 }
 0x2d0   :  { %v2231_v48 = vadd.f32 %v5076_v49, %v2230_v21  ;;  %v3111_v17 = vpop.f32.mrb[38].mxu0 }
 0x2d1   :  { %3489 = vtanh.f32 %v2239_v40  ;;  %v2242_v32 = vadd.f32 %v3111_v17, %v5076_v49  ;;  %v2233_v29 = vpop.f32.mrb[39].mxu0 }
 0x2d2   :  { %3491 = vtanh.f32 %v2231_v48  ;;  %v2234_v9 = vadd.f32 %v5076_v49, %v2233_v29 }
 0x2d3   :  { %v3482_v54 = vpop.eup %3481  ;;  %3493 = vtanh.f32 %v2242_v32 }
 0x2d4   :  { %v3484_v56 = vpop.eup %3483  ;;  %2535 = vst [vmem:[#allocation2 + $0x10] sm:$0xff] %v3482_v54  ;;  %3495 = vtanh.f32 %v2234_v9 }
 0x2d5   :  { %v3486_v39 = vpop.eup %3485  ;;  %2533 = vst [vmem:[#allocation2] sm:$0xff] %v3484_v56 }
 0x2d6   :  { %v3488_v8 = vpop.eup %3487  ;;  %2536 = vst [vmem:[#allocation2 + $0x18] sm:$0xff] %v3486_v39 }
 0x2d7   :  { %2534 = vst [vmem:[#allocation2 + $0x8] sm:$0xff] %v3488_v8 }
 0x2db   :  { %v3490_v33 = vpop.eup %3489 }
 0x2dc   :  { %v3114_v62 = vpop.f32.mrb[40].mxu0  ;;  %v3492_v19 = vpop.eup %3491  ;;  %2539 = vst [vmem:[#allocation2 + $0x30] sm:$0xff] %v3490_v33 }
 0x2dd   :  { %v2255_v53 = vadd.f32 %v3114_v62, %v5076_v49  ;;  %v2246_v61 = vpop.f32.mrb[41].mxu0  ;;  %v3494_v50 = vpop.eup %3493  ;;  %2537 = vst [vmem:[#allocation2 + $0x20] sm:$0xff] %v3492_v19 }
 0x2de   :  { %v2247_v22 = vadd.f32 %v5076_v49, %v2246_v61  ;;  %v3115_v6 = vpop.f32.mrb[42].mxu0  ;;  %v3496_v26 = vpop.eup %3495  ;;  %2540 = vst [vmem:[#allocation2 + $0x38] sm:$0xff] %v3494_v50 }
 0x2df   :  { %3497 = vtanh.f32 %v2255_v53  ;;  %v2258_v4 = vadd.f32 %v3115_v6, %v5076_v49  ;;  %v2249_v63 = vpop.f32.mrb[43].mxu0  ;;  %2538 = vst [vmem:[#allocation2 + $0x28] sm:$0xff] %v3496_v26 }
 0x2e0   :  { %3499 = vtanh.f32 %v2247_v22  ;;  %v2250_v7 = vadd.f32 %v5076_v49, %v2249_v63 }
 0x2e1   :  { %3501 = vtanh.f32 %v2258_v4 }
 0x2e2   :  { %3503 = vtanh.f32 %v2250_v7 }
 0x2e9   :  { %v3498_v43 = vpop.eup %3497 }
 0x2ea   :  { %v3500_v51 = vpop.eup %3499  ;;  %2543 = vst [vmem:[#allocation2 + $0x50] sm:$0xff] %v3498_v43 }
 0x2eb   :  { %v3502_v27 = vpop.eup %3501  ;;  %2541 = vst [vmem:[#allocation2 + $0x40] sm:$0xff] %v3500_v51 }
 0x2ec   :  { %v3504_v37 = vpop.eup %3503  ;;  %2544 = vst [vmem:[#allocation2 + $0x58] sm:$0xff] %v3502_v27 }
 0x2ed   :  { %2542 = vst [vmem:[#allocation2 + $0x48] sm:$0xff] %v3504_v37 }
 0x2ef   :  { %v3118_v47 = vpop.f32.mrb[44].mxu0 }
 0x2f0   :  { %v2271_v0 = vadd.f32 %v3118_v47, %v5076_v49  ;;  %v2262_v16 = vpop.f32.mrb[45].mxu0 }
 0x2f1   :  { %v2263_v2 = vadd.f32 %v5076_v49, %v2262_v16  ;;  %v3119_v14 = vpop.f32.mrb[46].mxu0 }
 0x2f2   :  { %3505 = vtanh.f32 %v2271_v0  ;;  %v2274_v13 = vadd.f32 %v3119_v14, %v5076_v49  ;;  %v2265_v59 = vpop.f32.mrb[47].mxu0 }
 0x2f3   :  { %3507 = vtanh.f32 %v2263_v2  ;;  %v2266_v55 = vadd.f32 %v5076_v49, %v2265_v59 }
 0x2f4   :  { %3509 = vtanh.f32 %v2274_v13 }
 0x2f5   :  { %3511 = vtanh.f32 %v2266_v55 }
 0x2fc   :  { %v3506_v38 = vpop.eup %3505 }
 0x2fd   :  { %v3508_v11 = vpop.eup %3507  ;;  %2547 = vst [vmem:[#allocation2 + $0x70] sm:$0xff] %v3506_v38 }
 0x2fe   :  { %v3510_v20 = vpop.eup %3509  ;;  %2545 = vst [vmem:[#allocation2 + $0x60] sm:$0xff] %v3508_v11 }
 0x2ff   :  { %v3512_v28 = vpop.eup %3511  ;;  %2548 = vst [vmem:[#allocation2 + $0x78] sm:$0xff] %v3510_v20 }
 0x300   :  { %2546 = vst [vmem:[#allocation2 + $0x68] sm:$0xff] %v3512_v28 }
 0x307   :  { %v3122_v57 = vpop.f32.mrb[48].mxu0 }
 0x308   :  { %v2287_v46 = vadd.f32 %v3122_v57, %v5076_v49  ;;  %v2278_v58 = vpop.f32.mrb[49].mxu0 }
 0x309   :  { %v2279_v5 = vadd.f32 %v5076_v49, %v2278_v58  ;;  %v3123_v60 = vpop.f32.mrb[50].mxu0 }
 0x30a   :  { %3513 = vtanh.f32 %v2287_v46  ;;  %v2290_v35 = vadd.f32 %v3123_v60, %v5076_v49  ;;  %v2281_v52 = vpop.f32.mrb[51].mxu0 }
 0x30b   :  { %3515 = vtanh.f32 %v2279_v5  ;;  %v2282_v24 = vadd.f32 %v5076_v49, %v2281_v52 }
 0x30c   :  { %3517 = vtanh.f32 %v2290_v35 }
 0x30d   :  { %3519 = vtanh.f32 %v2282_v24 }
 0x30f   :  { %v3126_v30 = vpop.f32.mrb[52].mxu0 }
 0x310   :  { %v2303_v41 = vadd.f32 %v3126_v30, %v5076_v49  ;;  %v2294_v44 = vpop.f32.mrb[53].mxu0 }
 0x311   :  { %v2295_v34 = vadd.f32 %v5076_v49, %v2294_v44  ;;  %v3127_v1 = vpop.f32.mrb[54].mxu0 }
 0x312   :  { %3521 = vtanh.f32 %v2303_v41  ;;  %v2306_v23 = vadd.f32 %v3127_v1, %v5076_v49  ;;  %v2297_v18 = vpop.f32.mrb[55].mxu0 }
 0x313   :  { %3523 = vtanh.f32 %v2295_v34  ;;  %v2298_v15 = vadd.f32 %v5076_v49, %v2297_v18 }
 0x314   :  { %v3514_v3 = vpop.eup %3513  ;;  %3525 = vtanh.f32 %v2306_v23 }
 0x315   :  { %v3516_v45 = vpop.eup %3515  ;;  %2551 = vst [vmem:[#allocation2 + $0x90] sm:$0xff] %v3514_v3  ;;  %3527 = vtanh.f32 %v2298_v15 }
 0x316   :  { %v3518_v12 = vpop.eup %3517  ;;  %2549 = vst [vmem:[#allocation2 + $0x80] sm:$0xff] %v3516_v45 }
 0x317   :  { %v3520_v36 = vpop.eup %3519  ;;  %2552 = vst [vmem:[#allocation2 + $0x98] sm:$0xff] %v3518_v12  ;;  %v3130_v10 = vpop.f32.mrb[56].mxu0 }
 0x318   :  { %2550 = vst [vmem:[#allocation2 + $0x88] sm:$0xff] %v3520_v36  ;;  %v2319_v31 = vadd.f32 %v3130_v10, %v5076_v49  ;;  %v2310_v42 = vpop.f32.mrb[57].mxu0 }
 0x319   :  { %v2311_v25 = vadd.f32 %v5076_v49, %v2310_v42  ;;  %v3131_v40 = vpop.f32.mrb[58].mxu0 }
 0x31a   :  { %3529 = vtanh.f32 %v2319_v31  ;;  %v2322_v21 = vadd.f32 %v3131_v40, %v5076_v49  ;;  %v2313_v48 = vpop.f32.mrb[59].mxu0 }
 0x31b   :  { %3531 = vtanh.f32 %v2311_v25  ;;  %v2314_v17 = vadd.f32 %v5076_v49, %v2313_v48 }
 0x31c   :  { %v3522_v32 = vpop.eup %3521  ;;  %3533 = vtanh.f32 %v2322_v21 }
 0x31d   :  { %v3524_v29 = vpop.eup %3523  ;;  %2555 = vst [vmem:[#allocation2 + $0xb0] sm:$0xff] %v3522_v32  ;;  %3535 = vtanh.f32 %v2314_v17 }
 0x31e   :  { %v3526_v9 = vpop.eup %3525  ;;  %2553 = vst [vmem:[#allocation2 + $0xa0] sm:$0xff] %v3524_v29 }
 0x31f   :  { %v3528_v54 = vpop.eup %3527  ;;  %2556 = vst [vmem:[#allocation2 + $0xb8] sm:$0xff] %v3526_v9 }
 0x320   :  { %2554 = vst [vmem:[#allocation2 + $0xa8] sm:$0xff] %v3528_v54 }
 0x324   :  { %v3530_v56 = vpop.eup %3529 }
 0x325   :  { %v3532_v39 = vpop.eup %3531  ;;  %2559 = vst [vmem:[#allocation2 + $0xd0] sm:$0xff] %v3530_v56 }
 0x326   :  { %v3534_v33 = vpop.eup %3533  ;;  %2557 = vst [vmem:[#allocation2 + $0xc0] sm:$0xff] %v3532_v39 }
 0x327   :  { %v3536_v53 = vpop.eup %3535  ;;  %2560 = vst [vmem:[#allocation2 + $0xd8] sm:$0xff] %v3534_v33 }
 0x328   :  { %v3134_v8 = vpop.f32.mrb[60].mxu0  ;;  %2558 = vst [vmem:[#allocation2 + $0xc8] sm:$0xff] %v3536_v53 }
 0x329   :  { %v2335_v62 = vadd.f32 %v3134_v8, %v5076_v49  ;;  %v2326_v19 = vpop.f32.mrb[61].mxu0 }
 0x32a   :  { %v2327_v61 = vadd.f32 %v5076_v49, %v2326_v19  ;;  %v3135_v50 = vpop.f32.mrb[62].mxu0 }
 0x32b   :  { %3537 = vtanh.f32 %v2335_v62  ;;  %v2338_v22 = vadd.f32 %v3135_v50, %v5076_v49  ;;  %v2329_v6 = vpop.f32.mrb[63].mxu0 }
 0x32c   :  { %3539 = vtanh.f32 %v2327_v61  ;;  %v2330_v26 = vadd.f32 %v5076_v49, %v2329_v6 }
 0x32d   :  { %3541 = vtanh.f32 %v2338_v22 }
 0x32e   :  { %3543 = vtanh.f32 %v2330_v26 }
 0x333   :  { %v3138_v4 = vpop.f32.mrb[64].mxu0 }
 0x334   :  { %v2351_v63 = vadd.f32 %v3138_v4, %v5076_v49  ;;  %v2342_v7 = vpop.f32.mrb[65].mxu0 }
 0x335   :  { %v2343_v43 = vadd.f32 %v5076_v49, %v2342_v7  ;;  %v3139_v51 = vpop.f32.mrb[66].mxu0  ;;  %v3538_v27 = vpop.eup %3537 }
 0x336   :  { %3545 = vtanh.f32 %v2351_v63  ;;  %v2354_v37 = vadd.f32 %v3139_v51, %v5076_v49  ;;  %v2345_v47 = vpop.f32.mrb[67].mxu0  ;;  %v3540_v0 = vpop.eup %3539  ;;  %2563 = vst [vmem:[#allocation2 + $0xf0] sm:$0xff] %v3538_v27 }
 0x337   :  { %3547 = vtanh.f32 %v2343_v43  ;;  %v2346_v16 = vadd.f32 %v5076_v49, %v2345_v47  ;;  %v3542_v2 = vpop.eup %3541  ;;  %2561 = vst [vmem:[#allocation2 + $0xe0] sm:$0xff] %v3540_v0 }
 0x338   :  { %3549 = vtanh.f32 %v2354_v37  ;;  %v3544_v14 = vpop.eup %3543  ;;  %2564 = vst [vmem:[#allocation2 + $0xf8] sm:$0xff] %v3542_v2 }
 0x339   :  { %3551 = vtanh.f32 %v2346_v16  ;;  %2562 = vst [vmem:[#allocation2 + $0xe8] sm:$0xff] %v3544_v14 }
 0x33b   :  { %v3142_v13 = vpop.f32.mrb[68].mxu0 }
 0x33c   :  { %v2367_v59 = vadd.f32 %v3142_v13, %v5076_v49  ;;  %v2358_v55 = vpop.f32.mrb[69].mxu0 }
 0x33d   :  { %v2359_v38 = vadd.f32 %v5076_v49, %v2358_v55  ;;  %v3143_v11 = vpop.f32.mrb[70].mxu0 }
 0x33e   :  { %3553 = vtanh.f32 %v2367_v59  ;;  %v2370_v20 = vadd.f32 %v3143_v11, %v5076_v49  ;;  %v2361_v28 = vpop.f32.mrb[71].mxu0 }
 0x33f   :  { %3555 = vtanh.f32 %v2359_v38  ;;  %v2362_v57 = vadd.f32 %v5076_v49, %v2361_v28 }
 0x340   :  { %v3546_v46 = vpop.eup %3545  ;;  %3557 = vtanh.f32 %v2370_v20 }
 0x341   :  { %v3548_v58 = vpop.eup %3547  ;;  %2567 = vst [vmem:[#allocation2 + $0x110] sm:$0xff] %v3546_v46  ;;  %3559 = vtanh.f32 %v2362_v57 }
 0x342   :  { %v3550_v5 = vpop.eup %3549  ;;  %2565 = vst [vmem:[#allocation2 + $0x100] sm:$0xff] %v3548_v58 }
 0x343   :  { %v3552_v60 = vpop.eup %3551  ;;  %2568 = vst [vmem:[#allocation2 + $0x118] sm:$0xff] %v3550_v5 }
 0x344   :  { %2566 = vst [vmem:[#allocation2 + $0x108] sm:$0xff] %v3552_v60  ;;  %v3146_v35 = vpop.f32.mrb[72].mxu0 }
 0x345   :  { %v2383_v52 = vadd.f32 %v3146_v35, %v5076_v49  ;;  %v2374_v24 = vpop.f32.mrb[73].mxu0 }
 0x346   :  { %v2375_v30 = vadd.f32 %v5076_v49, %v2374_v24  ;;  %v3147_v41 = vpop.f32.mrb[74].mxu0 }
 0x347   :  { %3561 = vtanh.f32 %v2383_v52  ;;  %v2386_v44 = vadd.f32 %v3147_v41, %v5076_v49  ;;  %v2377_v34 = vpop.f32.mrb[75].mxu0 }
 0x348   :  { %v3554_v1 = vpop.eup %3553  ;;  %3563 = vtanh.f32 %v2375_v30  ;;  %v2378_v23 = vadd.f32 %v5076_v49, %v2377_v34 }
 0x349   :  { %v3556_v18 = vpop.eup %3555  ;;  %2571 = vst [vmem:[#allocation2 + $0x130] sm:$0xff] %v3554_v1  ;;  %3565 = vtanh.f32 %v2386_v44 }
 0x34a   :  { %v3558_v3 = vpop.eup %3557  ;;  %2569 = vst [vmem:[#allocation2 + $0x120] sm:$0xff] %v3556_v18  ;;  %3567 = vtanh.f32 %v2378_v23 }
 0x34b   :  { %v3560_v15 = vpop.eup %3559  ;;  %2572 = vst [vmem:[#allocation2 + $0x138] sm:$0xff] %v3558_v3 }
 0x34c   :  { %2570 = vst [vmem:[#allocation2 + $0x128] sm:$0xff] %v3560_v15 }
 0x34f   :  { %v3150_v45 = vpop.f32.mrb[76].mxu0 }
 0x350   :  { %v2399_v12 = vadd.f32 %v3150_v45, %v5076_v49  ;;  %v2390_v36 = vpop.f32.mrb[77].mxu0 }
 0x351   :  { %v2391_v10 = vadd.f32 %v5076_v49, %v2390_v36  ;;  %v3151_v31 = vpop.f32.mrb[78].mxu0  ;;  %v3562_v42 = vpop.eup %3561 }
 0x352   :  { %3569 = vtanh.f32 %v2399_v12  ;;  %v2402_v25 = vadd.f32 %v3151_v31, %v5076_v49  ;;  %v2393_v40 = vpop.f32.mrb[79].mxu0  ;;  %v3564_v21 = vpop.eup %3563  ;;  %2575 = vst [vmem:[#allocation2 + $0x150] sm:$0xff] %v3562_v42 }
 0x353   :  { %3571 = vtanh.f32 %v2391_v10  ;;  %v2394_v48 = vadd.f32 %v5076_v49, %v2393_v40  ;;  %v3566_v17 = vpop.eup %3565  ;;  %2573 = vst [vmem:[#allocation2 + $0x140] sm:$0xff] %v3564_v21 }
 0x354   :  { %3573 = vtanh.f32 %v2402_v25  ;;  %v3568_v32 = vpop.eup %3567  ;;  %2576 = vst [vmem:[#allocation2 + $0x158] sm:$0xff] %v3566_v17 }
 0x355   :  { %3575 = vtanh.f32 %v2394_v48  ;;  %2574 = vst [vmem:[#allocation2 + $0x148] sm:$0xff] %v3568_v32 }
 0x358   :  { %v3154_v29 = vpop.f32.mrb[80].mxu0 }
 0x359   :  { %v2415_v9 = vadd.f32 %v3154_v29, %v5076_v49  ;;  %v2406_v54 = vpop.f32.mrb[81].mxu0 }
 0x35a   :  { %v2407_v56 = vadd.f32 %v5076_v49, %v2406_v54  ;;  %v3155_v39 = vpop.f32.mrb[82].mxu0 }
 0x35b   :  { %3577 = vtanh.f32 %v2415_v9  ;;  %v2418_v8 = vadd.f32 %v3155_v39, %v5076_v49  ;;  %v2409_v33 = vpop.f32.mrb[83].mxu0 }
 0x35c   :  { %v3570_v62 = vpop.eup %3569  ;;  %3579 = vtanh.f32 %v2407_v56  ;;  %v2410_v19 = vadd.f32 %v5076_v49, %v2409_v33 }
 0x35d   :  { %v3572_v53 = vpop.eup %3571  ;;  %2579 = vst [vmem:[#allocation2 + $0x170] sm:$0xff] %v3570_v62  ;;  %3581 = vtanh.f32 %v2418_v8 }
 0x35e   :  { %v3574_v61 = vpop.eup %3573  ;;  %2577 = vst [vmem:[#allocation2 + $0x160] sm:$0xff] %v3572_v53  ;;  %3583 = vtanh.f32 %v2410_v19 }
 0x35f   :  { %v3576_v50 = vpop.eup %3575  ;;  %2580 = vst [vmem:[#allocation2 + $0x178] sm:$0xff] %v3574_v61 }
 0x360   :  { %2578 = vst [vmem:[#allocation2 + $0x168] sm:$0xff] %v3576_v50  ;;  %v3158_v22 = vpop.f32.mrb[84].mxu0 }
 0x361   :  { %v2431_v6 = vadd.f32 %v3158_v22, %v5076_v49  ;;  %v2422_v26 = vpop.f32.mrb[85].mxu0 }
 0x362   :  { %v2423_v4 = vadd.f32 %v5076_v49, %v2422_v26  ;;  %v3159_v63 = vpop.f32.mrb[86].mxu0 }
 0x363   :  { %3585 = vtanh.f32 %v2431_v6  ;;  %v2434_v7 = vadd.f32 %v3159_v63, %v5076_v49  ;;  %v2425_v43 = vpop.f32.mrb[87].mxu0 }
 0x364   :  { %3587 = vtanh.f32 %v2423_v4  ;;  %v2426_v51 = vadd.f32 %v5076_v49, %v2425_v43 }
 0x365   :  { %v3578_v27 = vpop.eup %3577  ;;  %3589 = vtanh.f32 %v2434_v7 }
 0x366   :  { %v3580_v37 = vpop.eup %3579  ;;  %2583 = vst [vmem:[#allocation2 + $0x190] sm:$0xff] %v3578_v27  ;;  %3591 = vtanh.f32 %v2426_v51 }
 0x367   :  { %v3582_v47 = vpop.eup %3581  ;;  %2581 = vst [vmem:[#allocation2 + $0x180] sm:$0xff] %v3580_v37 }
 0x368   :  { %v3584_v0 = vpop.eup %3583  ;;  %2584 = vst [vmem:[#allocation2 + $0x198] sm:$0xff] %v3582_v47  ;;  %v3162_v16 = vpop.f32.mrb[88].mxu0 }
 0x369   :  { %2582 = vst [vmem:[#allocation2 + $0x188] sm:$0xff] %v3584_v0  ;;  %v2447_v2 = vadd.f32 %v3162_v16, %v5076_v49  ;;  %v2438_v14 = vpop.f32.mrb[89].mxu0 }
 0x36a   :  { %v2439_v13 = vadd.f32 %v5076_v49, %v2438_v14  ;;  %v3163_v59 = vpop.f32.mrb[90].mxu0 }
 0x36b   :  { %3593 = vtanh.f32 %v2447_v2  ;;  %v2450_v55 = vadd.f32 %v3163_v59, %v5076_v49  ;;  %v2441_v38 = vpop.f32.mrb[91].mxu0 }
 0x36c   :  { %3595 = vtanh.f32 %v2439_v13  ;;  %v2442_v11 = vadd.f32 %v5076_v49, %v2441_v38 }
 0x36d   :  { %v3586_v20 = vpop.eup %3585  ;;  %3597 = vtanh.f32 %v2450_v55 }
 0x36e   :  { %v3588_v28 = vpop.eup %3587  ;;  %2587 = vst [vmem:[#allocation2 + $0x1b0] sm:$0xff] %v3586_v20  ;;  %3599 = vtanh.f32 %v2442_v11 }
 0x36f   :  { %v3590_v57 = vpop.eup %3589  ;;  %2585 = vst [vmem:[#allocation2 + $0x1a0] sm:$0xff] %v3588_v28 }
 0x370   :  { %v3592_v46 = vpop.eup %3591  ;;  %2588 = vst [vmem:[#allocation2 + $0x1b8] sm:$0xff] %v3590_v57  ;;  %v3166_v58 = vpop.f32.mrb[92].mxu0 }
 0x371   :  { %2586 = vst [vmem:[#allocation2 + $0x1a8] sm:$0xff] %v3592_v46  ;;  %v2463_v5 = vadd.f32 %v3166_v58, %v5076_v49  ;;  %v2454_v60 = vpop.f32.mrb[93].mxu0 }
 0x372   :  { %v2455_v35 = vadd.f32 %v5076_v49, %v2454_v60  ;;  %v3167_v52 = vpop.f32.mrb[94].mxu0 }
 0x373   :  { %3601 = vtanh.f32 %v2463_v5  ;;  %v2466_v24 = vadd.f32 %v3167_v52, %v5076_v49  ;;  %v2457_v30 = vpop.f32.mrb[95].mxu0 }
 0x374   :  { %3603 = vtanh.f32 %v2455_v35  ;;  %v2458_v41 = vadd.f32 %v5076_v49, %v2457_v30 }
 0x375   :  { %v3594_v44 = vpop.eup %3593  ;;  %3605 = vtanh.f32 %v2466_v24 }
 0x376   :  { %v3596_v34 = vpop.eup %3595  ;;  %2591 = vst [vmem:[#allocation2 + $0x1d0] sm:$0xff] %v3594_v44  ;;  %3607 = vtanh.f32 %v2458_v41 }
 0x377   :  { %v3598_v1 = vpop.eup %3597  ;;  %2589 = vst [vmem:[#allocation2 + $0x1c0] sm:$0xff] %v3596_v34 }
 0x378   :  { %v3600_v23 = vpop.eup %3599  ;;  %2592 = vst [vmem:[#allocation2 + $0x1d8] sm:$0xff] %v3598_v1 }
 0x379   :  { %2590 = vst [vmem:[#allocation2 + $0x1c8] sm:$0xff] %v3600_v23 }
 0x37d   :  { %v3602_v18 = vpop.eup %3601 }
 0x37e   :  { %v3604_v3 = vpop.eup %3603  ;;  %2595 = vst [vmem:[#allocation2 + $0x1f0] sm:$0xff] %v3602_v18 }
 0x37f   :  { %v3606_v15 = vpop.eup %3605  ;;  %2593 = vst [vmem:[#allocation2 + $0x1e0] sm:$0xff] %v3604_v3 }
 0x380   :  { %v3608_v45 = vpop.eup %3607  ;;  %2596 = vst [vmem:[#allocation2 + $0x1f8] sm:$0xff] %v3606_v15 }
 0x381   :  { %2594 = vst [vmem:[#allocation2 + $0x1e8] sm:$0xff] %v3608_v45 }
 0x382   :  { %3622 = shalt.err (!%p3619_p4)
}
 0x383   :  { %s3623_s12 = scalar_lea.hbm %s5161_s7, 8192 }
 0x384   :  { %p3624_p5 = scmp.ne.s32.totalorder %s5161_s7, %s3623_s12  ;;  %p3627_p6 = scmp.lt.u32.totalorder %s3623_s12, %s5161_s7 }
 0x386   :  { %p3629_p7 = pnand %p3627_p6, %p3624_p5 }
 0x388   :  { %3632 = shalt.err (!%p3629_p7)
}
 0x389   :  { %s3636_s16 = smov 128   ;;  %s3637_s17 = smov 8  }
 0x38a   :  { %2608 = dma.vmem_to_hbm [thread:$0]  %s2603_s1, 8192, %s5161_s7, [#allocation3], %s3636_s16, %s3636_s16, %s3637_s17  }
 0x38b   :  { %3633 = dma.done.wait [#allocation3], 8192  }
 0x38c   :  { %3634 = vsyncadd [#allocation3], 4294959104 }
 0x38d   :  { %2612 = vsyncpa [#allocation3], 1 }

</bundles_post_ra>
